<compile_context>
chip_gen: v7x
topology: tpu7x:2x2x1
jax: 0.10.0
libtpu: 0.0.40
codegen_flags: <defaults>
</compile_context>

<pallas_src>
import math
import functools

import jax
import jax.numpy as jnp
from jax.experimental import pallas as pl
from jax.experimental.pallas import tpu as pltpu


# ---------------------------------------------------------------------------
# In-kernel helpers
# ---------------------------------------------------------------------------
def _layernorm(x, gamma, beta, eps=1e-5):
    mu = jnp.mean(x, axis=-1, keepdims=True)
    var = jnp.mean((x - mu) ** 2, axis=-1, keepdims=True)
    return (x - mu) * jax.lax.rsqrt(var + eps) * gamma + beta


# ---------------------------------------------------------------------------
# Fused encoder-stack kernel: one grid step = one encoder layer (for one
# batch block); activation lives in VMEM scratch across the layer axis.
# ---------------------------------------------------------------------------
def _encoder_stack_kernel(src_ref, pos_ref,
                          wqk_ref, wv_ref, wo_ref, w1_ref, w2_ref,
                          vecd_ref, vecf_ref,
                          out_ref,
                          x_ref,                       # VMEM scratch (B*S, D) f32
                          *, nhead, seq_len, batch):
    B, S = batch, seq_len
    D = src_ref.shape[-1]
    hd = D // nhead
    scale = 1.0 / math.sqrt(hd)

    layer = pl.program_id(1)
    last = pl.num_programs(1) - 1

    # Layer 0: load the activation slab into the resident VMEM scratch.
    @pl.when(layer == 0)
    def _():
        x_ref[...] = src_ref[...].reshape(B * S, D).astype(jnp.float32)

    x2 = x_ref[...]                                            # (B*S, D) f32
    pos2 = pos_ref[...].reshape(B * S, D).astype(jnp.float32)  # (B*S, D)

    # Per-layer weights (pre-transposed wrapper-side: x @ W, no .T here).
    wqk = wqk_ref[0].astype(jnp.float32)    # (D, 2D)  [Wq.T | Wk.T]
    wv = wv_ref[0].astype(jnp.float32)      # (D, D)
    wo = wo_ref[0].astype(jnp.float32)      # (D, D)   rows = attn-input dims
    w1 = w1_ref[0].astype(jnp.float32)      # (D, Dff)
    w2 = w2_ref[0].astype(jnp.float32)      # (Dff, D)

    vd = vecd_ref[0].astype(jnp.float32)    # (9, D) packed small params
    bq, bk, bv = vd[0:1], vd[1:2], vd[2:3]
    bo, b2 = vd[3:4], vd[4:5]
    n1g, n1b = vd[5:6], vd[6:7]
    n2g, n2b = vd[7:8], vd[8:9]
    b1 = vecf_ref[0].astype(jnp.float32)    # (1, Dff)

    # ---- Multi-head self-attention -------------------------------------
    qk_in = x2 + pos2                       # q = k = src + pos, v uses src

    # Fused Q/K projection: one (B*S, D) @ (D, 2D) matmul.
    qk = jnp.dot(qk_in, wqk, preferred_element_type=jnp.float32)   # (B*S, 2D)
    q = qk[:, :D] + bq
    k = qk[:, D:] + bk
    v = jnp.dot(x2, wv, preferred_element_type=jnp.float32) + bv   # (B*S, D)

    q3 = (q * scale).reshape(B, S, D)
    k3 = k.reshape(B, S, D)
    v3 = v.reshape(B, S, D)

    # Heads unrolled statically; each head uses batch-dim einsums and folds the
    # output projection (its Wo row-slice) into the loop -> no concatenate.
    attn = jnp.zeros((B * S, D), jnp.float32)
    for h in range(nhead):
        sl = slice(h * hd, (h + 1) * hd)
        s = jnp.einsum('bqd,bkd->bqk', q3[..., sl], k3[..., sl],
                       preferred_element_type=jnp.float32)          # (B, S, S)
        s = s - jnp.max(s, axis=-1, keepdims=True)
        p = jnp.exp(s)
        p = p * pl.reciprocal(jnp.sum(p, axis=-1, keepdims=True), approx=True)
        ctx = jnp.einsum('bqk,bkd->bqd', p, v3[..., sl],
                         preferred_element_type=jnp.float32)         # (B, S, hd)
        attn = attn + jnp.dot(ctx.reshape(B * S, hd), wo[sl, :],
                              preferred_element_type=jnp.float32)    # (B*S, D)
    attn = attn + bo

    # ---- residual + norm1 ------------------------------------------------
    x2 = _layernorm(x2 + attn, n1g, n1b)

    # ---- feed-forward ------------------------------------------------------
    h1 = jnp.maximum(jnp.dot(x2, w1, preferred_element_type=jnp.float32) + b1,
                     0.0)
    h2 = jnp.dot(h1, w2, preferred_element_type=jnp.float32) + b2

    # ---- residual + norm2 --------------------------------------------------
    x2 = _layernorm(x2 + h2, n2g, n2b)

    x_ref[...] = x2

    @pl.when(layer == last)
    def _():
        out_ref[...] = x2.reshape(B, S, D).astype(out_ref.dtype)


# ---------------------------------------------------------------------------
# Wrapper: packing (layout plumbing outside the kernel) + pallas_call
# ---------------------------------------------------------------------------
def _pack_params(layer_params, d_model, dim_ff):
    D, Dff = d_model, dim_ff
    wqk, wv, wo, w1, w2, vecd, vecf = [], [], [], [], [], [], []
    for p in layer_params:
        w_in, b_in = p["in_proj_weight"], p["in_proj_bias"]
        wqk.append(jnp.transpose(w_in[:2 * D]))            # (D, 2D)
        wv.append(jnp.transpose(w_in[2 * D:]))             # (D, D)
        wo.append(jnp.transpose(p["out_proj_weight"]))     # (D, D)
        w1.append(jnp.transpose(p["linear1_weight"]))      # (D, Dff)
        w2.append(jnp.transpose(p["linear2_weight"]))      # (Dff, D)
        vecd.append(jnp.stack([
            b_in[:D], b_in[D:2 * D], b_in[2 * D:],
            p["out_proj_bias"], p["linear2_bias"],
            p["norm1_weight"], p["norm1_bias"],
            p["norm2_weight"], p["norm2_bias"]], axis=0))  # (9, D)
        vecf.append(p["linear1_bias"].reshape(1, Dff))     # (1, Dff)
    stk = lambda xs: jnp.stack(xs, axis=0)
    return stk(wqk), stk(wv), stk(wo), stk(w1), stk(w2), stk(vecd), stk(vecf)


def transformer_encoder_forward(src_sbd, pos_sbd, layer_params, *, nhead,
                                batch_blocks=1):
    """src_sbd / pos_sbd: (S, B, D) like PyTorch nn.MultiheadAttention input.

    `batch_blocks=2` (B even) gives a >=2-step "parallel" grid axis so both
    v7x TensorCores are used; batch_blocks=1 folds the whole batch into one
    block (fewest pipeline steps, best for v5e/v6e at small B).
    """
    S, B, D = src_sbd.shape
    L = len(layer_params)
    Dff = layer_params[0]["linear1_weight"].shape[0]
    assert D % nhead == 0
    assert B % batch_blocks == 0
    bpb = B // batch_blocks

    # Single transpose for the whole stack (sequence-first -> batch-first).
    src = jnp.transpose(src_sbd, (1, 0, 2))                 # (B, S, D)
    pos = jnp.transpose(pos_sbd, (1, 0, 2))
    wqk, wv, wo, w1, w2, vecd, vecf = _pack_params(layer_params, D, Dff)

    # Explicit VMEM budget (double-buffered blocks + scratch + margin), capped
    # at v7x's 64 MiB physical VMEM.
    blk_elems = (3 * bpb * S * D
                 + D * 2 * D + 2 * D * D + 2 * D * Dff
                 + 9 * D + Dff)
    vmem_limit = int(min(max(16 * blk_elems + 4 * bpb * S * D + (2 << 20),
                             16 << 20), 64 << 20))

    weight_spec = lambda shape: pl.BlockSpec((1,) + shape,
                                             lambda bb, l: (l, 0, 0))
    act_spec = pl.BlockSpec((bpb, S, D), lambda bb, l: (bb, 0, 0))

    kernel = functools.partial(_encoder_stack_kernel,
                               nhead=nhead, seq_len=S, batch=bpb)

    out = pl.pallas_call(
        kernel,
        out_shape=jax.ShapeDtypeStruct((B, S, D), jnp.float32),
        grid_spec=pltpu.PrefetchScalarGridSpec(
            num_scalar_prefetch=0,
            grid=(batch_blocks, L),
            in_specs=[
                act_spec,                        # src
                act_spec,                        # pos
                weight_spec((D, 2 * D)),         # fused Q/K weight (pre-T)
                weight_spec((D, D)),             # V weight (pre-T)
                weight_spec((D, D)),             # out_proj weight (pre-T)
                weight_spec((D, Dff)),           # linear1 weight (pre-T)
                weight_spec((Dff, D)),           # linear2 weight (pre-T)
                weight_spec((9, D)),             # packed D-sized biases/norms
                weight_spec((1, Dff)),           # linear1 bias
            ],
            out_specs=act_spec,
            scratch_shapes=[pltpu.VMEM((bpb * S, D), jnp.float32)],
        ),
        compiler_params=pltpu.CompilerParams(
            dimension_semantics=("parallel", "arbitrary"),
            vmem_limit_bytes=vmem_limit,
        ),
    )(src, pos, wqk, wv, wo, w1, w2, vecd, vecf)

    return jnp.transpose(out, (1, 0, 2))                    # back to (S, B, D)


# ---------------------------------------------------------------------------
# Pure-JAX reference (PyTorch-shaped params) for a sanity check
# ---------------------------------------------------------------------------
def _ln_ref(x, g, b, eps=1e-5):
    mu = jnp.mean(x, axis=-1, keepdims=True)
    var = jnp.mean((x - mu) ** 2, axis=-1, keepdims=True)
    return (x - mu) * jax.lax.rsqrt(var + eps) * g + b


def _ref_layer(x, pos, p, nhead):
    D = x.shape[-1]
    hd = D // nhead
    qk = x + pos
    w_in, b_in = p["in_proj_weight"], p["in_proj_bias"]
    q = qk @ w_in[:D].T + b_in[:D]
    k = qk @ w_in[D:2 * D].T + b_in[D:2 * D]
    v = x @ w_in[2 * D:].T + b_in[2 * D:]
    outs = []
    for h in range(nhead):
        sl = slice(h * hd, (h + 1) * hd)
        s = (q[..., sl] / math.sqrt(hd)) @ jnp.swapaxes(k[..., sl], -1, -2)
        outs.append(jax.nn.softmax(s, axis=-1) @ v[..., sl])
    attn = jnp.concatenate(outs, -1) @ p["out_proj_weight"].T + p["out_proj_bias"]
    x = _ln_ref(x + attn, p["norm1_weight"], p["norm1_bias"])
    h1 = jnp.maximum(x @ p["linear1_weight"].T + p["linear1_bias"], 0.0)
    h2 = h1 @ p["linear2_weight"].T + p["linear2_bias"]
    return _ln_ref(x + h2, p["norm2_weight"], p["norm2_bias"])


def _ref_encoder(src_sbd, pos_sbd, layer_params, nhead):
    x = jnp.transpose(src_sbd, (1, 0, 2))
    pos = jnp.transpose(pos_sbd, (1, 0, 2))
    for p in layer_params:
        x = _ref_layer(x, pos, p, nhead)
    return jnp.transpose(x, (1, 0, 2))


# ---------------------------------------------------------------------------
# Deterministic parameter construction (PyTorch-natural shapes)
# ---------------------------------------------------------------------------
def make_layer_params(key, d_model, dim_ff):
    ks = jax.random.split(key, 8)
    sd = 0.02
    return {
        "in_proj_weight": sd * jax.random.normal(ks[0], (3 * d_model, d_model), jnp.float32),
        "in_proj_bias": sd * jax.random.normal(ks[1], (3 * d_model,), jnp.float32),
        "out_proj_weight": sd * jax.random.normal(ks[2], (d_model, d_model), jnp.float32),
        "out_proj_bias": sd * jax.random.normal(ks[3], (d_model,), jnp.float32),
        "linear1_weight": sd * jax.random.normal(ks[4], (dim_ff, d_model), jnp.float32),
        "linear1_bias": sd * jax.random.normal(ks[5], (dim_ff,), jnp.float32),
        "linear2_weight": sd * jax.random.normal(ks[6], (d_model, dim_ff), jnp.float32),
        "linear2_bias": sd * jax.random.normal(ks[7], (d_model,), jnp.float32),
        "norm1_weight": jnp.ones((d_model,), jnp.float32),
        "norm1_bias": jnp.zeros((d_model,), jnp.float32),
        "norm2_weight": jnp.ones((d_model,), jnp.float32),
        "norm2_bias": jnp.zeros((d_model,), jnp.float32),
    }


if __name__ == "__main__":
    S, B, D = 8, 2, 32          # seq, batch, d_model
    NHEAD = 4
    DIM_FF = 64
    NUM_LAYERS = 2

    root = jax.random.PRNGKey(0)
    k_src, k_pos, k_par = jax.random.split(root, 3)
    src = jax.random.normal(k_src, (S, B, D), jnp.float32)
    pos = jax.random.normal(k_pos, (S, B, D), jnp.float32)
    layer_keys = jax.random.split(k_par, NUM_LAYERS)
    layer_params = [make_layer_params(k, D, DIM_FF) for k in layer_keys]

    out = transformer_encoder_forward(src, pos, layer_params, nhead=NHEAD)
    out = jax.block_until_ready(out)

    ref = jax.block_until_ready(_ref_encoder(src, pos, layer_params, NHEAD))
    assert out.shape == (S, B, D)
    # approx=True softmax reciprocal -> slightly looser tolerance than exact.
    assert bool(jnp.allclose(out, ref, atol=2e-3, rtol=2e-3)), \
        float(jnp.max(jnp.abs(out - ref)))

    print("KERNEL_OK")
</pallas_src>

<mosaic_0001>
module attributes {stable_mosaic.version = 11 : i64} {
  func.func @_encoder_stack_kernel(%arg0: i32, %arg1: i32, %arg2: memref<2x8x32xf32, #tpu.memory_space<vmem>>, %arg3: memref<2x8x32xf32, #tpu.memory_space<vmem>>, %arg4: memref<1x32x64xf32, #tpu.memory_space<vmem>>, %arg5: memref<1x32x32xf32, #tpu.memory_space<vmem>>, %arg6: memref<1x32x32xf32, #tpu.memory_space<vmem>>, %arg7: memref<1x32x64xf32, #tpu.memory_space<vmem>>, %arg8: memref<1x64x32xf32, #tpu.memory_space<vmem>>, %arg9: memref<1x9x32xf32, #tpu.memory_space<vmem>>, %arg10: memref<1x1x64xf32, #tpu.memory_space<vmem>>, %arg11: memref<2x8x32xf32, #tpu.memory_space<vmem>>, %arg12: memref<16x32xf32, #tpu.memory_space<vmem>>) attributes {dimension_semantics = [#tpu.dimension_semantics<parallel>, #tpu.dimension_semantics<arbitrary>], iteration_bounds = array<i64: 1, 2>, scalar_prefetch = 0 : i64, scratch_operands = 1 : i64, tpu.core_type = #tpu.core_type<tc>, window_params = [{transform_indices = @transform_0, window_bounds = array<i64: 2, 8, 32>}, {transform_indices = @transform_1, window_bounds = array<i64: 2, 8, 32>}, {transform_indices = @transform_2, window_bounds = array<i64: 1, 32, 64>}, {transform_indices = @transform_3, window_bounds = array<i64: 1, 32, 32>}, {transform_indices = @transform_4, window_bounds = array<i64: 1, 32, 32>}, {transform_indices = @transform_5, window_bounds = array<i64: 1, 32, 64>}, {transform_indices = @transform_6, window_bounds = array<i64: 1, 64, 32>}, {transform_indices = @transform_7, window_bounds = array<i64: 1, 9, 32>}, {transform_indices = @transform_8, window_bounds = array<i64: 1, 1, 64>}, {transform_indices = @transform_9, window_bounds = array<i64: 2, 8, 32>}]} {
    %c0_i32 = arith.constant 0 : i32
    %0 = arith.cmpi eq, %arg1, %c0_i32 : i32
    %1 = arith.extui %0 : i1 to i32
    %c0_i32_0 = arith.constant 0 : i32
    %2 = arith.cmpi ne, %1, %c0_i32_0 : i32
    scf.if %2 {
      %c0_65 = arith.constant 0 : index
      %c0_66 = arith.constant 0 : index
      %c0_67 = arith.constant 0 : index
      %182 = vector.load %arg2[%c0_65, %c0_66, %c0_67] : memref<2x8x32xf32, #tpu.memory_space<vmem>>, vector<2x8x32xf32>
      %183 = vector.shape_cast %182 : vector<2x8x32xf32> to vector<16x32xf32>
      %c0_68 = arith.constant 0 : index
      %c0_69 = arith.constant 0 : index
      %184 = vector.load %arg12[%c0_68, %c0_69] : memref<16x32xf32, #tpu.memory_space<vmem>>, vector<16x32xf32>
      tpu.vector_store %arg12[%c0_68, %c0_69], %183 {strides = array<i32>} : memref<16x32xf32, #tpu.memory_space<vmem>>, vector<16x32xf32>,
    } else {
    }
    %c0 = arith.constant 0 : index
    %c0_1 = arith.constant 0 : index
    %3 = vector.load %arg12[%c0, %c0_1] : memref<16x32xf32, #tpu.memory_space<vmem>>, vector<16x32xf32>
    %c0_2 = arith.constant 0 : index
    %c0_3 = arith.constant 0 : index
    %c0_4 = arith.constant 0 : index
    %4 = vector.load %arg3[%c0_2, %c0_3, %c0_4] : memref<2x8x32xf32, #tpu.memory_space<vmem>>, vector<2x8x32xf32>
    %5 = vector.shape_cast %4 : vector<2x8x32xf32> to vector<16x32xf32>
    %c0_5 = arith.constant 0 : index
    %c0_6 = arith.constant 0 : index
    %c0_7 = arith.constant 0 : index
    %6 = vector.load %arg4[%c0_5, %c0_6, %c0_7] : memref<1x32x64xf32, #tpu.memory_space<vmem>>, vector<1x32x64xf32>
    %7 = vector.shape_cast %6 : vector<1x32x64xf32> to vector<32x64xf32>
    %c0_8 = arith.constant 0 : index
    %c0_9 = arith.constant 0 : index
    %c0_10 = arith.constant 0 : index
    %8 = vector.load %arg5[%c0_8, %c0_9, %c0_10] : memref<1x32x32xf32, #tpu.memory_space<vmem>>, vector<1x32x32xf32>
    %9 = vector.shape_cast %8 : vector<1x32x32xf32> to vector<32x32xf32>
    %c0_11 = arith.constant 0 : index
    %c0_12 = arith.constant 0 : index
    %c0_13 = arith.constant 0 : index
    %10 = vector.load %arg6[%c0_11, %c0_12, %c0_13] : memref<1x32x32xf32, #tpu.memory_space<vmem>>, vector<1x32x32xf32>
    %11 = vector.shape_cast %10 : vector<1x32x32xf32> to vector<32x32xf32>
    %c0_14 = arith.constant 0 : index
    %c0_15 = arith.constant 0 : index
    %c0_16 = arith.constant 0 : index
    %12 = vector.load %arg7[%c0_14, %c0_15, %c0_16] : memref<1x32x64xf32, #tpu.memory_space<vmem>>, vector<1x32x64xf32>
    %13 = vector.shape_cast %12 : vector<1x32x64xf32> to vector<32x64xf32>
    %c0_17 = arith.constant 0 : index
    %c0_18 = arith.constant 0 : index
    %c0_19 = arith.constant 0 : index
    %14 = vector.load %arg8[%c0_17, %c0_18, %c0_19] : memref<1x64x32xf32, #tpu.memory_space<vmem>>, vector<1x64x32xf32>
    %15 = vector.shape_cast %14 : vector<1x64x32xf32> to vector<64x32xf32>
    %c0_20 = arith.constant 0 : index
    %c0_21 = arith.constant 0 : index
    %c0_22 = arith.constant 0 : index
    %16 = vector.load %arg9[%c0_20, %c0_21, %c0_22] : memref<1x9x32xf32, #tpu.memory_space<vmem>>, vector<1x9x32xf32>
    %17 = vector.shape_cast %16 : vector<1x9x32xf32> to vector<9x32xf32>
    %18 = vector.extract_strided_slice %17 {offsets = [0, 0], sizes = [1, 32], strides = [1, 1]} : vector<9x32xf32> to vector<1x32xf32>
    %19 = vector.extract_strided_slice %17 {offsets = [1, 0], sizes = [1, 32], strides = [1, 1]} : vector<9x32xf32> to vector<1x32xf32>
    %20 = vector.extract_strided_slice %17 {offsets = [2, 0], sizes = [1, 32], strides = [1, 1]} : vector<9x32xf32> to vector<1x32xf32>
    %21 = vector.extract_strided_slice %17 {offsets = [3, 0], sizes = [1, 32], strides = [1, 1]} : vector<9x32xf32> to vector<1x32xf32>
    %22 = vector.extract_strided_slice %17 {offsets = [4, 0], sizes = [1, 32], strides = [1, 1]} : vector<9x32xf32> to vector<1x32xf32>
    %23 = vector.extract_strided_slice %17 {offsets = [5, 0], sizes = [1, 32], strides = [1, 1]} : vector<9x32xf32> to vector<1x32xf32>
    %24 = vector.extract_strided_slice %17 {offsets = [6, 0], sizes = [1, 32], strides = [1, 1]} : vector<9x32xf32> to vector<1x32xf32>
    %25 = vector.extract_strided_slice %17 {offsets = [7, 0], sizes = [1, 32], strides = [1, 1]} : vector<9x32xf32> to vector<1x32xf32>
    %26 = vector.extract_strided_slice %17 {offsets = [8, 0], sizes = [1, 32], strides = [1, 1]} : vector<9x32xf32> to vector<1x32xf32>
    %c0_23 = arith.constant 0 : index
    %c0_24 = arith.constant 0 : index
    %c0_25 = arith.constant 0 : index
    %27 = vector.load %arg10[%c0_23, %c0_24, %c0_25] : memref<1x1x64xf32, #tpu.memory_space<vmem>>, vector<1x1x64xf32>
    %28 = vector.shape_cast %27 : vector<1x1x64xf32> to vector<1x64xf32>
    %29 = arith.addf %3, %5 : vector<16x32xf32>
    %cst = arith.constant dense<0.000000e+00> : vector<16x64xf32>
    %30 = tpu.matmul %29, %7, %cst {dimension_numbers = #tpu.dot_dimension_numbers<[1], [0], [0], [1], [0, 0, 1, 1], [], []>} : vector<16x32xf32>, vector<32x64xf32>, vector<16x64xf32> -> vector<16x64xf32>
    %31 = vector.extract_strided_slice %30 {offsets = [0, 0], sizes = [16, 32], strides = [1, 1]} : vector<16x64xf32> to vector<16x32xf32>
    %32 = vector.broadcast %18 : vector<1x32xf32> to vector<16x32xf32>
    %33 = arith.addf %31, %32 : vector<16x32xf32>
    %34 = vector.extract_strided_slice %30 {offsets = [0, 32], sizes = [16, 32], strides = [1, 1]} : vector<16x64xf32> to vector<16x32xf32>
    %35 = vector.broadcast %19 : vector<1x32xf32> to vector<16x32xf32>
    %36 = arith.addf %34, %35 : vector<16x32xf32>
    %cst_26 = arith.constant dense<0.000000e+00> : vector<16x32xf32>
    %37 = tpu.matmul %3, %9, %cst_26 {dimension_numbers = #tpu.dot_dimension_numbers<[1], [0], [0], [1], [0, 0, 1, 1], [], []>} : vector<16x32xf32>, vector<32x32xf32>, vector<16x32xf32> -> vector<16x32xf32>
    %38 = vector.broadcast %20 : vector<1x32xf32> to vector<16x32xf32>
    %39 = arith.addf %37, %38 : vector<16x32xf32>
    %cst_27 = arith.constant 0.353553385 : f32
    %40 = vector.broadcast %cst_27 : f32 to vector<16x32xf32>
    %41 = arith.mulf %33, %40 : vector<16x32xf32>
    %42 = vector.shape_cast %41 : vector<16x32xf32> to vector<2x8x32xf32>
    %43 = vector.shape_cast %36 : vector<16x32xf32> to vector<2x8x32xf32>
    %44 = vector.shape_cast %39 : vector<16x32xf32> to vector<2x8x32xf32>
    %cst_28 = arith.constant 0.000000e+00 : f32
    %45 = vector.broadcast %cst_28 : f32 to vector<16x32xf32>
    %46 = vector.extract_strided_slice %42 {offsets = [0, 0, 0], sizes = [2, 8, 8], strides = [1, 1, 1]} : vector<2x8x32xf32> to vector<2x8x8xf32>
    %47 = vector.extract_strided_slice %43 {offsets = [0, 0, 0], sizes = [2, 8, 8], strides = [1, 1, 1]} : vector<2x8x32xf32> to vector<2x8x8xf32>
    "tpu.trace_start"() <{level = 10 : i32, message = "bqd,bkd->bqk"}> : () -> ()
    %cst_29 = arith.constant dense<0.000000e+00> : vector<2x8x8xf32>
    %48 = tpu.matmul %46, %47, %cst_29 {dimension_numbers = #tpu.dot_dimension_numbers<[2], [2], [1], [1], [0, 0, 0, 1, 1, 1], [0], [0]>} : vector<2x8x8xf32>, vector<2x8x8xf32>, vector<2x8x8xf32> -> vector<2x8x8xf32>
    "tpu.trace_stop"() : () -> ()
    %cst_30 = arith.constant dense<0xFF800000> : vector<2x8xf32>
    %49 = vector.multi_reduction <maximumf>, %48, %cst_30 [2] : vector<2x8x8xf32> to vector<2x8xf32>
    %50 = vector.shape_cast %49 : vector<2x8xf32> to vector<2x8x1xf32>
    %51 = vector.broadcast %50 : vector<2x8x1xf32> to vector<2x8x8xf32>
    %52 = arith.subf %48, %51 : vector<2x8x8xf32>
    %53 = math.exp %52 : vector<2x8x8xf32>
    %cst_31 = arith.constant dense<0.000000e+00> : vector<2x8xf32>
    %54 = vector.multi_reduction <add>, %53, %cst_31 [2] : vector<2x8x8xf32> to vector<2x8xf32>
    %55 = vector.shape_cast %54 : vector<2x8xf32> to vector<2x8x1xf32>
    %56 = tpu.reciprocal %55 {approx = true} : vector<2x8x1xf32> -> vector<2x8x1xf32>
    %57 = vector.broadcast %56 : vector<2x8x1xf32> to vector<2x8x8xf32>
    %58 = arith.mulf %53, %57 : vector<2x8x8xf32>
    %59 = vector.extract_strided_slice %44 {offsets = [0, 0, 0], sizes = [2, 8, 8], strides = [1, 1, 1]} : vector<2x8x32xf32> to vector<2x8x8xf32>
    "tpu.trace_start"() <{level = 10 : i32, message = "bqk,bkd->bqd"}> : () -> ()
    %cst_32 = arith.constant dense<0.000000e+00> : vector<2x8x8xf32>
    %60 = tpu.matmul %58, %59, %cst_32 {dimension_numbers = #tpu.dot_dimension_numbers<[2], [1], [1], [2], [0, 0, 0, 1, 1, 2], [0], [0]>} : vector<2x8x8xf32>, vector<2x8x8xf32>, vector<2x8x8xf32> -> vector<2x8x8xf32>
    "tpu.trace_stop"() : () -> ()
    %61 = vector.shape_cast %60 : vector<2x8x8xf32> to vector<16x8xf32>
    %62 = vector.extract_strided_slice %11 {offsets = [0, 0], sizes = [8, 32], strides = [1, 1]} : vector<32x32xf32> to vector<8x32xf32>
    %cst_33 = arith.constant dense<0.000000e+00> : vector<16x32xf32>
    %63 = tpu.matmul %61, %62, %cst_33 {dimension_numbers = #tpu.dot_dimension_numbers<[1], [0], [0], [1], [0, 0, 1, 1], [], []>} : vector<16x8xf32>, vector<8x32xf32>, vector<16x32xf32> -> vector<16x32xf32>
    %64 = arith.addf %45, %63 : vector<16x32xf32>
    %65 = vector.extract_strided_slice %42 {offsets = [0, 0, 8], sizes = [2, 8, 8], strides = [1, 1, 1]} : vector<2x8x32xf32> to vector<2x8x8xf32>
    %66 = vector.extract_strided_slice %43 {offsets = [0, 0, 8], sizes = [2, 8, 8], strides = [1, 1, 1]} : vector<2x8x32xf32> to vector<2x8x8xf32>
    "tpu.trace_start"() <{level = 10 : i32, message = "bqd,bkd->bqk"}> : () -> ()
    %cst_34 = arith.constant dense<0.000000e+00> : vector<2x8x8xf32>
    %67 = tpu.matmul %65, %66, %cst_34 {dimension_numbers = #tpu.dot_dimension_numbers<[2], [2], [1], [1], [0, 0, 0, 1, 1, 1], [0], [0]>} : vector<2x8x8xf32>, vector<2x8x8xf32>, vector<2x8x8xf32> -> vector<2x8x8xf32>
    "tpu.trace_stop"() : () -> ()
    %cst_35 = arith.constant dense<0xFF800000> : vector<2x8xf32>
    %68 = vector.multi_reduction <maximumf>, %67, %cst_35 [2] : vector<2x8x8xf32> to vector<2x8xf32>
    %69 = vector.shape_cast %68 : vector<2x8xf32> to vector<2x8x1xf32>
    %70 = vector.broadcast %69 : vector<2x8x1xf32> to vector<2x8x8xf32>
    %71 = arith.subf %67, %70 : vector<2x8x8xf32>
    %72 = math.exp %71 : vector<2x8x8xf32>
    %cst_36 = arith.constant dense<0.000000e+00> : vector<2x8xf32>
    %73 = vector.multi_reduction <add>, %72, %cst_36 [2] : vector<2x8x8xf32> to vector<2x8xf32>
    %74 = vector.shape_cast %73 : vector<2x8xf32> to vector<2x8x1xf32>
    %75 = tpu.reciprocal %74 {approx = true} : vector<2x8x1xf32> -> vector<2x8x1xf32>
    %76 = vector.broadcast %75 : vector<2x8x1xf32> to vector<2x8x8xf32>
    %77 = arith.mulf %72, %76 : vector<2x8x8xf32>
    %78 = vector.extract_strided_slice %44 {offsets = [0, 0, 8], sizes = [2, 8, 8], strides = [1, 1, 1]} : vector<2x8x32xf32> to vector<2x8x8xf32>
    "tpu.trace_start"() <{level = 10 : i32, message = "bqk,bkd->bqd"}> : () -> ()
    %cst_37 = arith.constant dense<0.000000e+00> : vector<2x8x8xf32>
    %79 = tpu.matmul %77, %78, %cst_37 {dimension_numbers = #tpu.dot_dimension_numbers<[2], [1], [1], [2], [0, 0, 0, 1, 1, 2], [0], [0]>} : vector<2x8x8xf32>, vector<2x8x8xf32>, vector<2x8x8xf32> -> vector<2x8x8xf32>
    "tpu.trace_stop"() : () -> ()
    %80 = vector.shape_cast %79 : vector<2x8x8xf32> to vector<16x8xf32>
    %81 = vector.extract_strided_slice %11 {offsets = [8, 0], sizes = [8, 32], strides = [1, 1]} : vector<32x32xf32> to vector<8x32xf32>
    %cst_38 = arith.constant dense<0.000000e+00> : vector<16x32xf32>
    %82 = tpu.matmul %80, %81, %cst_38 {dimension_numbers = #tpu.dot_dimension_numbers<[1], [0], [0], [1], [0, 0, 1, 1], [], []>} : vector<16x8xf32>, vector<8x32xf32>, vector<16x32xf32> -> vector<16x32xf32>
    %83 = arith.addf %64, %82 : vector<16x32xf32>
    %84 = vector.extract_strided_slice %42 {offsets = [0, 0, 16], sizes = [2, 8, 8], strides = [1, 1, 1]} : vector<2x8x32xf32> to vector<2x8x8xf32>
    %85 = vector.extract_strided_slice %43 {offsets = [0, 0, 16], sizes = [2, 8, 8], strides = [1, 1, 1]} : vector<2x8x32xf32> to vector<2x8x8xf32>
    "tpu.trace_start"() <{level = 10 : i32, message = "bqd,bkd->bqk"}> : () -> ()
    %cst_39 = arith.constant dense<0.000000e+00> : vector<2x8x8xf32>
    %86 = tpu.matmul %84, %85, %cst_39 {dimension_numbers = #tpu.dot_dimension_numbers<[2], [2], [1], [1], [0, 0, 0, 1, 1, 1], [0], [0]>} : vector<2x8x8xf32>, vector<2x8x8xf32>, vector<2x8x8xf32> -> vector<2x8x8xf32>
    "tpu.trace_stop"() : () -> ()
    %cst_40 = arith.constant dense<0xFF800000> : vector<2x8xf32>
    %87 = vector.multi_reduction <maximumf>, %86, %cst_40 [2] : vector<2x8x8xf32> to vector<2x8xf32>
    %88 = vector.shape_cast %87 : vector<2x8xf32> to vector<2x8x1xf32>
    %89 = vector.broadcast %88 : vector<2x8x1xf32> to vector<2x8x8xf32>
    %90 = arith.subf %86, %89 : vector<2x8x8xf32>
    %91 = math.exp %90 : vector<2x8x8xf32>
    %cst_41 = arith.constant dense<0.000000e+00> : vector<2x8xf32>
    %92 = vector.multi_reduction <add>, %91, %cst_41 [2] : vector<2x8x8xf32> to vector<2x8xf32>
    %93 = vector.shape_cast %92 : vector<2x8xf32> to vector<2x8x1xf32>
    %94 = tpu.reciprocal %93 {approx = true} : vector<2x8x1xf32> -> vector<2x8x1xf32>
    %95 = vector.broadcast %94 : vector<2x8x1xf32> to vector<2x8x8xf32>
    %96 = arith.mulf %91, %95 : vector<2x8x8xf32>
    %97 = vector.extract_strided_slice %44 {offsets = [0, 0, 16], sizes = [2, 8, 8], strides = [1, 1, 1]} : vector<2x8x32xf32> to vector<2x8x8xf32>
    "tpu.trace_start"() <{level = 10 : i32, message = "bqk,bkd->bqd"}> : () -> ()
    %cst_42 = arith.constant dense<0.000000e+00> : vector<2x8x8xf32>
    %98 = tpu.matmul %96, %97, %cst_42 {dimension_numbers = #tpu.dot_dimension_numbers<[2], [1], [1], [2], [0, 0, 0, 1, 1, 2], [0], [0]>} : vector<2x8x8xf32>, vector<2x8x8xf32>, vector<2x8x8xf32> -> vector<2x8x8xf32>
    "tpu.trace_stop"() : () -> ()
    %99 = vector.shape_cast %98 : vector<2x8x8xf32> to vector<16x8xf32>
    %100 = vector.extract_strided_slice %11 {offsets = [16, 0], sizes = [8, 32], strides = [1, 1]} : vector<32x32xf32> to vector<8x32xf32>
    %cst_43 = arith.constant dense<0.000000e+00> : vector<16x32xf32>
    %101 = tpu.matmul %99, %100, %cst_43 {dimension_numbers = #tpu.dot_dimension_numbers<[1], [0], [0], [1], [0, 0, 1, 1], [], []>} : vector<16x8xf32>, vector<8x32xf32>, vector<16x32xf32> -> vector<16x32xf32>
    %102 = arith.addf %83, %101 : vector<16x32xf32>
    %103 = vector.extract_strided_slice %42 {offsets = [0, 0, 24], sizes = [2, 8, 8], strides = [1, 1, 1]} : vector<2x8x32xf32> to vector<2x8x8xf32>
    %104 = vector.extract_strided_slice %43 {offsets = [0, 0, 24], sizes = [2, 8, 8], strides = [1, 1, 1]} : vector<2x8x32xf32> to vector<2x8x8xf32>
    "tpu.trace_start"() <{level = 10 : i32, message = "bqd,bkd->bqk"}> : () -> ()
    %cst_44 = arith.constant dense<0.000000e+00> : vector<2x8x8xf32>
    %105 = tpu.matmul %103, %104, %cst_44 {dimension_numbers = #tpu.dot_dimension_numbers<[2], [2], [1], [1], [0, 0, 0, 1, 1, 1], [0], [0]>} : vector<2x8x8xf32>, vector<2x8x8xf32>, vector<2x8x8xf32> -> vector<2x8x8xf32>
    "tpu.trace_stop"() : () -> ()
    %cst_45 = arith.constant dense<0xFF800000> : vector<2x8xf32>
    %106 = vector.multi_reduction <maximumf>, %105, %cst_45 [2] : vector<2x8x8xf32> to vector<2x8xf32>
    %107 = vector.shape_cast %106 : vector<2x8xf32> to vector<2x8x1xf32>
    %108 = vector.broadcast %107 : vector<2x8x1xf32> to vector<2x8x8xf32>
    %109 = arith.subf %105, %108 : vector<2x8x8xf32>
    %110 = math.exp %109 : vector<2x8x8xf32>
    %cst_46 = arith.constant dense<0.000000e+00> : vector<2x8xf32>
    %111 = vector.multi_reduction <add>, %110, %cst_46 [2] : vector<2x8x8xf32> to vector<2x8xf32>
    %112 = vector.shape_cast %111 : vector<2x8xf32> to vector<2x8x1xf32>
    %113 = tpu.reciprocal %112 {approx = true} : vector<2x8x1xf32> -> vector<2x8x1xf32>
    %114 = vector.broadcast %113 : vector<2x8x1xf32> to vector<2x8x8xf32>
    %115 = arith.mulf %110, %114 : vector<2x8x8xf32>
    %116 = vector.extract_strided_slice %44 {offsets = [0, 0, 24], sizes = [2, 8, 8], strides = [1, 1, 1]} : vector<2x8x32xf32> to vector<2x8x8xf32>
    "tpu.trace_start"() <{level = 10 : i32, message = "bqk,bkd->bqd"}> : () -> ()
    %cst_47 = arith.constant dense<0.000000e+00> : vector<2x8x8xf32>
    %117 = tpu.matmul %115, %116, %cst_47 {dimension_numbers = #tpu.dot_dimension_numbers<[2], [1], [1], [2], [0, 0, 0, 1, 1, 2], [0], [0]>} : vector<2x8x8xf32>, vector<2x8x8xf32>, vector<2x8x8xf32> -> vector<2x8x8xf32>
    "tpu.trace_stop"() : () -> ()
    %118 = vector.shape_cast %117 : vector<2x8x8xf32> to vector<16x8xf32>
    %119 = vector.extract_strided_slice %11 {offsets = [24, 0], sizes = [8, 32], strides = [1, 1]} : vector<32x32xf32> to vector<8x32xf32>
    %cst_48 = arith.constant dense<0.000000e+00> : vector<16x32xf32>
    %120 = tpu.matmul %118, %119, %cst_48 {dimension_numbers = #tpu.dot_dimension_numbers<[1], [0], [0], [1], [0, 0, 1, 1], [], []>} : vector<16x8xf32>, vector<8x32xf32>, vector<16x32xf32> -> vector<16x32xf32>
    %121 = arith.addf %102, %120 : vector<16x32xf32>
    %122 = vector.broadcast %21 : vector<1x32xf32> to vector<16x32xf32>
    %123 = arith.addf %121, %122 : vector<16x32xf32>
    %124 = arith.addf %3, %123 : vector<16x32xf32>
    %cst_49 = arith.constant dense<0.000000e+00> : vector<16xf32>
    %125 = vector.multi_reduction <add>, %124, %cst_49 [1] : vector<16x32xf32> to vector<16xf32>
    %126 = vector.shape_cast %125 : vector<16xf32> to vector<16x1xf32>
    %cst_50 = arith.constant 3.200000e+01 : f32
    %127 = vector.broadcast %cst_50 : f32 to vector<16x1xf32>
    %128 = arith.divf %126, %127 : vector<16x1xf32>
    %129 = vector.broadcast %128 : vector<16x1xf32> to vector<16x32xf32>
    %130 = arith.subf %124, %129 : vector<16x32xf32>
    %131 = arith.mulf %130, %130 : vector<16x32xf32>
    %cst_51 = arith.constant dense<0.000000e+00> : vector<16xf32>
    %132 = vector.multi_reduction <add>, %131, %cst_51 [1] : vector<16x32xf32> to vector<16xf32>
    %133 = vector.shape_cast %132 : vector<16xf32> to vector<16x1xf32>
    %cst_52 = arith.constant 3.200000e+01 : f32
    %134 = vector.broadcast %cst_52 : f32 to vector<16x1xf32>
    %135 = arith.divf %133, %134 : vector<16x1xf32>
    %136 = vector.broadcast %128 : vector<16x1xf32> to vector<16x32xf32>
    %137 = arith.subf %124, %136 : vector<16x32xf32>
    %cst_53 = arith.constant 9.99999974E-6 : f32
    %138 = vector.broadcast %cst_53 : f32 to vector<16x1xf32>
    %139 = arith.addf %135, %138 : vector<16x1xf32>
    %140 = math.rsqrt %139 : vector<16x1xf32>
    %141 = vector.broadcast %140 : vector<16x1xf32> to vector<16x32xf32>
    %142 = arith.mulf %137, %141 : vector<16x32xf32>
    %143 = vector.broadcast %23 : vector<1x32xf32> to vector<16x32xf32>
    %144 = arith.mulf %142, %143 : vector<16x32xf32>
    %145 = vector.broadcast %24 : vector<1x32xf32> to vector<16x32xf32>
    %146 = arith.addf %144, %145 : vector<16x32xf32>
    %cst_54 = arith.constant dense<0.000000e+00> : vector<16x64xf32>
    %147 = tpu.matmul %146, %13, %cst_54 {dimension_numbers = #tpu.dot_dimension_numbers<[1], [0], [0], [1], [0, 0, 1, 1], [], []>} : vector<16x32xf32>, vector<32x64xf32>, vector<16x64xf32> -> vector<16x64xf32>
    %148 = vector.broadcast %28 : vector<1x64xf32> to vector<16x64xf32>
    %149 = arith.addf %147, %148 : vector<16x64xf32>
    %cst_55 = arith.constant 0.000000e+00 : f32
    %150 = vector.broadcast %cst_55 : f32 to vector<16x64xf32>
    %151 = arith.maximumf %149, %150 : vector<16x64xf32>
    %cst_56 = arith.constant dense<0.000000e+00> : vector<16x32xf32>
    %152 = tpu.matmul %151, %15, %cst_56 {dimension_numbers = #tpu.dot_dimension_numbers<[1], [0], [0], [1], [0, 0, 1, 1], [], []>} : vector<16x64xf32>, vector<64x32xf32>, vector<16x32xf32> -> vector<16x32xf32>
    %153 = vector.broadcast %22 : vector<1x32xf32> to vector<16x32xf32>
    %154 = arith.addf %152, %153 : vector<16x32xf32>
    %155 = arith.addf %146, %154 : vector<16x32xf32>
    %cst_57 = arith.constant dense<0.000000e+00> : vector<16xf32>
    %156 = vector.multi_reduction <add>, %155, %cst_57 [1] : vector<16x32xf32> to vector<16xf32>
    %157 = vector.shape_cast %156 : vector<16xf32> to vector<16x1xf32>
    %cst_58 = arith.constant 3.200000e+01 : f32
    %158 = vector.broadcast %cst_58 : f32 to vector<16x1xf32>
    %159 = arith.divf %157, %158 : vector<16x1xf32>
    %160 = vector.broadcast %159 : vector<16x1xf32> to vector<16x32xf32>
    %161 = arith.subf %155, %160 : vector<16x32xf32>
    %162 = arith.mulf %161, %161 : vector<16x32xf32>
    %cst_59 = arith.constant dense<0.000000e+00> : vector<16xf32>
    %163 = vector.multi_reduction <add>, %162, %cst_59 [1] : vector<16x32xf32> to vector<16xf32>
    %164 = vector.shape_cast %163 : vector<16xf32> to vector<16x1xf32>
    %cst_60 = arith.constant 3.200000e+01 : f32
    %165 = vector.broadcast %cst_60 : f32 to vector<16x1xf32>
    %166 = arith.divf %164, %165 : vector<16x1xf32>
    %167 = vector.broadcast %159 : vector<16x1xf32> to vector<16x32xf32>
    %168 = arith.subf %155, %167 : vector<16x32xf32>
    %cst_61 = arith.constant 9.99999974E-6 : f32
    %169 = vector.broadcast %cst_61 : f32 to vector<16x1xf32>
    %170 = arith.addf %166, %169 : vector<16x1xf32>
    %171 = math.rsqrt %170 : vector<16x1xf32>
    %172 = vector.broadcast %171 : vector<16x1xf32> to vector<16x32xf32>
    %173 = arith.mulf %168, %172 : vector<16x32xf32>
    %174 = vector.broadcast %25 : vector<1x32xf32> to vector<16x32xf32>
    %175 = arith.mulf %173, %174 : vector<16x32xf32>
    %176 = vector.broadcast %26 : vector<1x32xf32> to vector<16x32xf32>
    %177 = arith.addf %175, %176 : vector<16x32xf32>
    %c0_62 = arith.constant 0 : index
    %c0_63 = arith.constant 0 : index
    %178 = vector.load %arg12[%c0_62, %c0_63] : memref<16x32xf32, #tpu.memory_space<vmem>>, vector<16x32xf32>
    tpu.vector_store %arg12[%c0_62, %c0_63], %177 {strides = array<i32>} : memref<16x32xf32, #tpu.memory_space<vmem>>, vector<16x32xf32>,
    %c1_i32 = arith.constant 1 : i32
    %179 = arith.cmpi eq, %arg1, %c1_i32 : i32
    %180 = arith.extui %179 : i1 to i32
    %c0_i32_64 = arith.constant 0 : i32
    %181 = arith.cmpi ne, %180, %c0_i32_64 : i32
    scf.if %181 {
      %182 = vector.shape_cast %177 : vector<16x32xf32> to vector<2x8x32xf32>
      %c0_65 = arith.constant 0 : index
      %c0_66 = arith.constant 0 : index
      %c0_67 = arith.constant 0 : index
      %183 = vector.load %arg11[%c0_65, %c0_66, %c0_67] : memref<2x8x32xf32, #tpu.memory_space<vmem>>, vector<2x8x32xf32>
      tpu.vector_store %arg11[%c0_65, %c0_66, %c0_67], %182 {strides = array<i32>} : memref<2x8x32xf32, #tpu.memory_space<vmem>>, vector<2x8x32xf32>,
    } else {
    }
    return
  }
  func.func @transform_0(%arg0: i32, %arg1: i32) -> (i32, i32, i32) {
    %c0_i32 = arith.constant 0 : i32
    %c0_i32_0 = arith.constant 0 : i32
    %c0_i32_1 = arith.constant 0 : i32
    return %arg0, %c0_i32, %c0_i32_0 : i32, i32, i32
  }
  func.func @transform_1(%arg0: i32, %arg1: i32) -> (i32, i32, i32) {
    %c0_i32 = arith.constant 0 : i32
    %c0_i32_0 = arith.constant 0 : i32
    %c0_i32_1 = arith.constant 0 : i32
    return %arg0, %c0_i32, %c0_i32_0 : i32, i32, i32
  }
  func.func @transform_2(%arg0: i32, %arg1: i32) -> (i32, i32, i32) {
    %c0_i32 = arith.constant 0 : i32
    %c0_i32_0 = arith.constant 0 : i32
    %c0_i32_1 = arith.constant 0 : i32
    return %arg1, %c0_i32, %c0_i32_0 : i32, i32, i32
  }
  func.func @transform_3(%arg0: i32, %arg1: i32) -> (i32, i32, i32) {
    %c0_i32 = arith.constant 0 : i32
    %c0_i32_0 = arith.constant 0 : i32
    %c0_i32_1 = arith.constant 0 : i32
    return %arg1, %c0_i32, %c0_i32_0 : i32, i32, i32
  }
  func.func @transform_4(%arg0: i32, %arg1: i32) -> (i32, i32, i32) {
    %c0_i32 = arith.constant 0 : i32
    %c0_i32_0 = arith.constant 0 : i32
    %c0_i32_1 = arith.constant 0 : i32
    return %arg1, %c0_i32, %c0_i32_0 : i32, i32, i32
  }
  func.func @transform_5(%arg0: i32, %arg1: i32) -> (i32, i32, i32) {
    %c0_i32 = arith.constant 0 : i32
    %c0_i32_0 = arith.constant 0 : i32
    %c0_i32_1 = arith.constant 0 : i32
    return %arg1, %c0_i32, %c0_i32_0 : i32, i32, i32
  }
  func.func @transform_6(%arg0: i32, %arg1: i32) -> (i32, i32, i32) {
    %c0_i32 = arith.constant 0 : i32
    %c0_i32_0 = arith.constant 0 : i32
    %c0_i32_1 = arith.constant 0 : i32
    return %arg1, %c0_i32, %c0_i32_0 : i32, i32, i32
  }
  func.func @transform_7(%arg0: i32, %arg1: i32) -> (i32, i32, i32) {
    %c0_i32 = arith.constant 0 : i32
    %c0_i32_0 = arith.constant 0 : i32
    %c0_i32_1 = arith.constant 0 : i32
    return %arg1, %c0_i32, %c0_i32_0 : i32, i32, i32
  }
  func.func @transform_8(%arg0: i32, %arg1: i32) -> (i32, i32, i32) {
    %c0_i32 = arith.constant 0 : i32
    %c0_i32_0 = arith.constant 0 : i32
    %c0_i32_1 = arith.constant 0 : i32
    return %arg1, %c0_i32, %c0_i32_0 : i32, i32, i32
  }
  func.func @transform_9(%arg0: i32, %arg1: i32) -> (i32, i32, i32) {
    %c0_i32 = arith.constant 0 : i32
    %c0_i32_0 = arith.constant 0 : i32
    %c0_i32_1 = arith.constant 0 : i32
    return %arg0, %c0_i32, %c0_i32_0 : i32, i32, i32
  }
}

</mosaic_0001>

<bundles_post_ra>
// kernel: tpu_custom_call.1
= control target key start
LH: loop header
LB: loop body
LE: loop exit
PB: predicated region body
PF: predicated region fallthrough
CT: control target
= control target key end

     0   :  { %s4029_s0 = inlined_call_operand.hbm [shape: f32[2,8,32], index: 0, kind: input, shape index: {}]   ;;  %s4030_s1 = inlined_call_operand.hbm [shape: f32[2,8,32], index: 1, kind: input, shape index: {}]   ;;  %s4031_s2 = inlined_call_operand.vmem [shape: f32[2,32,64], index: 2, kind: input, shape index: {}]   ;;  %s4032_s3 = inlined_call_operand.vmem [shape: f32[2,32,32], index: 3, kind: input, shape index: {}]   ;;  %s4033_s4 = inlined_call_operand.vmem [shape: f32[2,32,32], index: 4, kind: input, shape index: {}]   ;;  %s4034_s5 = inlined_call_operand.hbm [shape: f32[2,32,64], index: 5, kind: input, shape index: {}]   ;;  %s4035_s6 = inlined_call_operand.vmem [shape: f32[2,64,32], index: 6, kind: input, shape index: {}]   ;;  %s4036_s7 = inlined_call_operand.vmem [shape: f32[2,9,32], index: 7, kind: input, shape index: {}]   ;;  %s4037_s8 = inlined_call_operand.vmem [shape: f32[2,1,64], index: 8, kind: input, shape index: {}]   ;;  %s4038_s9 = inlined_call_operand.hbm [shape: f32[2,8,32], index: 9, kind: output, shape index: {}]  }
   0x1   :  { %4046 = sst [smem:[#allocation15_spill]] %s4029_s0 }
   0x2   :  { %4047 = sst [smem:[#allocation16_spill]] %s4030_s1 }
   0x3   :  { %4048 = sst [smem:[#allocation17_spill]] %s4031_s2 }
   0x4   :  { %4049 = sst [smem:[#allocation18_spill]] %s4034_s5 }
   0x5   :  { %4050 = sst [smem:[#allocation19_spill]] %s4036_s7 }
   0x6   :  { %4051 = sst [smem:[#allocation20_spill]] %s4037_s8 }
   0x7   :  { %4052 = sst [smem:[#allocation21_spill]] %s4038_s9 }
   0x8   :  { %14 = vsyncpa [#allocation4], 0 }
   0x9   :  { %15 = vsyncpa [#allocation7], 0 }
   0xa   :  { %16 = vsyncpa [#allocation5], 0  ;;  %s3550_s30 = smov 0   ;;  %s3552_s10 = smov 0  }
   0xb   :  { %s3554_s11 = smov 0   ;;  %s3556_s12 = smov 0  }
   0xc   :  { %s3558_s13 = smov 0   ;;  %s3560_s14 = smov 0  }
   0xd LB: > { %s3579_s15 = sadd.s32 4294967295, %s3480_s14   ;;  %p178_p0 = scmp.ne.s32.totalorder %s3468_s11, %s3464_s10  ;;  %s3480_s14 = sphi %s3560_s14, %s22_s14   ;;  %s3476_s13 = sphi %s3558_s13, %s4079_s13   ;;  %s3472_s12 = sphi %s3556_s12, %s4078_s12   ;;  %s3468_s11 = sphi %s3554_s11, %s4077_s11   ;;  %s3464_s10 = sphi %s3552_s10, %s4076_s10   ;;  %s3460_s30 = sphi %s3550_s30, %s4075_s30  }
   0xe   : > { %p179_p1 = scmp.eq.s32.totalorder %s3480_s14, 0  ;;  %p184_p2 = scmp.ne.s32.totalorder %s3464_s10, %s3460_s30 }
   0xf   : > { %p4039_p3 = scmp.eq.s32.totalorder %s3579_s15, 0  ;;  %p2824_p4 = scmp.ge.s32.totalorder %s3480_s14, 1 }
  0x10   : > { %p180_p5 = por %p179_p1, %p178_p0  ;;  %p299_p6 = scmp.lt.s32.totalorder %s3480_s14, 3 }
  0x11   : > { %p3590_p7 = por %p4039_p3, %p184_p2  ;;  %s3482_s18 = smov [#allocation3]  }
  0x12   : > { %p3594_p8 = pnand %p2824_p4, %p299_p6  ;;  %s314_s19 = sshll.u32 %s3482_s18, 4  ;;  %s315_s19 = int_to_ptr.vmem [resolvable:$true] %s314_s19 }
  0x13   : > { %s4053_s16 = scalar_select %p3590_p7, 1, 0 }
  0x14   : > { %s4054_s17 = scalar_select %p3594_p8, 1, 0 }
  0x15   : > { %p3183_p9 = pneg %p3594_p8  ;;  %p3196_p11 = scmp.lt.s32.totalorder %s3480_s14, 2 }
  0x16   : > { %s4057_s0 = sld [smem:[#allocation15_spill]] }
  0x17   : > { %p3602_p10 = pnand %p3183_p9, %p4039_p3  ;;  %p3607_p12 = pnand %p3196_p11, %p180_p5 }
  0x19   : > { %s4056_s21 = scalar_select %p3607_p12, 1, 0 }
  0x1a   : > { %p3308_p0 = pneg %p3602_p10 }
  0x1c   : > { %s3306_s24 = scalar_lea.hbm %s4057_s0, 256 }
  0x1d   : > { %p3307_p13 = scmp.ne.s32.totalorder %s4057_s0, %s3306_s24  ;;  %p3313_p4 = scmp.lt.u32.totalorder %s3306_s24, %s4057_s0 }
  0x1f   : > { %p3309_p1 = pnand %p3308_p0, %p3307_p13 }
  0x21   : > { %p3310_p2 = pneg %p3309_p1 }
  0x23   : > { %p3315_p5 = pnand %p3313_p4, %p3310_p2 }
  0x25   : > { %3318 = shalt.err (!%p3315_p5)
}
  0x26   : > { %s3319_s29 = scalar_lea.vmem %s315_s19, 256  ;;  %p3327_p3 = scmp.lt.s32.totalorder %s315_s19, %s315_s19 }
  0x27   : > { %p3320_p6 = scmp.ne.s32.totalorder %s315_s19, %s3319_s29  ;;  %p3328_p7 = scmp.lt.s32.totalorder %s3319_s29, %s3319_s29 }
  0x29   : > { %p3322_p9 = pnand %p3320_p6, %p3308_p0  ;;  %p3329_p8 = por %p3328_p7, %p3327_p3 }
  0x2b   : > { %p3323_p11 = pneg %p3322_p9 }
  0x2d   : > { %p3330_p12 = pnand %p3329_p8, %p3323_p11 }
  0x2f   : > { %3333 = shalt.err (!%p3330_p12)
}
  0x30   : > { %s4044_s30 = smov 128   ;;  %s3484_s18 = smov 8  }
  0x31   : > { %3186 = dma.hbm_to_vmem [thread:$0]  (!%p3602_p10), %s4057_s0, 256, %s315_s19, [#allocation4], %s4044_s30, %s4044_s30, %s3484_s18  }
  0x32   : > { %s3485_s24 = smov [#allocation6]   ;;  %s4058_s1 = sld [smem:[#allocation16_spill]] }
  0x33   : > { %s330_s25 = sshll.u32 %s3485_s24, 4  ;;  %s331_s25 = int_to_ptr.vmem [resolvable:$true] %s330_s25 }
  0x38   : > { %s3334_s28 = scalar_lea.hbm %s4058_s1, 256 }
  0x39   : > { %p3335_p3 = scmp.ne.s32.totalorder %s4058_s1, %s3334_s28  ;;  %p3341_p12 = scmp.lt.u32.totalorder %s3334_s28, %s4058_s1 }
  0x3b   : > { %p3337_p7 = pnand %p3335_p3, %p3308_p0 }
  0x3d   : > { %p3338_p8 = pneg %p3337_p7 }
  0x3f   : > { %p3343_p13 = pnand %p3341_p12, %p3338_p8 }
  0x41   : > { %3346 = shalt.err (!%p3343_p13)
}
  0x42   : > { %s3347_s19 = scalar_lea.vmem %s331_s25, 256  ;;  %p3355_p5 = scmp.lt.s32.totalorder %s331_s25, %s331_s25 }
  0x43   : > { %p3348_p1 = scmp.ne.s32.totalorder %s331_s25, %s3347_s19  ;;  %p3356_p6 = scmp.lt.s32.totalorder %s3347_s19, %s3347_s19 }
  0x45   : > { %p3350_p2 = pnand %p3348_p1, %p3308_p0  ;;  %p3357_p9 = por %p3356_p6, %p3355_p5 }
  0x47   : > { %p3351_p4 = pneg %p3350_p2 }
  0x49   : > { %p3358_p11 = pnand %p3357_p9, %p3351_p4 }
  0x4b   : > { %3361 = shalt.err (!%p3358_p11)
}
  0x4c   : > { %3189 = dma.hbm_to_vmem [thread:$0]  (!%p3602_p10), %s4058_s1, 256, %s331_s25, [#allocation7], %s4044_s30, %s4044_s30, %s3484_s18  }
  0x4d   : > { %s31_s9 = sadd.s32 1, %s3476_s13  ;;  %s171_s22 = sadd.s32 1, %s3468_s11 }
  0x4e   : > { %p32_p0 = scmp.ge.s32.totalorder %s31_s9, 2  ;;  %s368_s23 = sand.u32 1, %s3480_s14  }
  0x4f   : > { %s370_s20 = sand.u32 1, %s3468_s11   ;;  %s2893_s26 = sshll.u32 %s3476_s13, 9 }
  0x50   : > { %s4081_s9 = smov (%p32_p0, %s31_s9), 0  ;;  %s2828_s24 = sshll.u32 %s370_s20, 5 }
  0x51   : > { %4059 = sst [smem:[#allocation14_spill]] %s4081_s9  ;;  %s168_s27 = ssub.s32 %s3476_s13, %s4081_s9 }
  0x52   : > { %p169_p3 = scmp.eq.s32.totalorder %s168_s27, 0  ;;  %s4060_s5 = sld [smem:[#allocation18_spill]] }
  0x53   : > { %s372_s25 = scalar_lea.vmem [#allocation8], %s2828_s24  ;;  %s3678_s30 = scalar_lea.sflag [#allocation4], %s368_s23 }
  0x54   : > { %s379_s7 = sshll.u32 %s372_s25, 4  ;;  %p4061_p7 = scmp.ne.s32.totalorder %s4056_s21, 0  ;;  %s3676_s7 = int_to_ptr.vmem [resolvable:$true] %s379_s7 }
  0x55   : > { %s3674_s8 = scalar_select %p169_p3, %s3468_s11, %s171_s22  }
  0x56   : > { %p3364_p8 = pneg %p4061_p7 }
  0x58   : > { %s3671_s19 = scalar_lea.hbm %s4060_s5, %s2893_s26  ;;  %s3367_s28 = scalar_lea.hbm %s4060_s5, 1024 }
  0x59   : > { %s3362_s20 = scalar_lea.hbm %s3671_s19, 512  ;;  %p3368_p1 = scmp.lt.u32.totalorder %s3671_s19, %s4060_s5 }
  0x5a   : > { %p3363_p10 = scmp.ne.s32.totalorder %s3671_s19, %s3362_s20  ;;  %p3369_p2 = scmp.lt.u32.totalorder %s3367_s28, %s3362_s20 }
  0x5b   : > { %p3371_p5 = scmp.lt.u32.totalorder %s3362_s20, %s3671_s19 }
  0x5c   : > { %p3365_p12 = pnand %p3364_p8, %p3363_p10  ;;  %p3370_p4 = por %p3369_p2, %p3368_p1 }
  0x5e   : > { %p3366_p13 = pneg %p3365_p12  ;;  %p3372_p6 = por %p3371_p5, %p3370_p4 }
  0x60   : > { %p3373_p9 = pnand %p3372_p6, %p3366_p13 }
  0x62   : > { %3376 = shalt.err (!%p3373_p9)
}
  0x63   : > { %s3377_s22 = scalar_lea.vmem %s3676_s7, 512  ;;  %s3486_s23 = smov [#allocation8]  }
  0x64   : > { %p3378_p11 = scmp.ne.s32.totalorder %s3676_s7, %s3377_s22  ;;  %s3382_s25 = sshll.u32 %s3486_s23, 4  ;;  %s3383_s25 = int_to_ptr.vmem [resolvable:$false] %s3382_s25 }
  0x65   : > { %s3384_s26 = scalar_lea.vmem %s3383_s25, 1024  ;;  %p3385_p10 = scmp.lt.s32.totalorder %s3676_s7, %s3383_s25 }
  0x66   : > { %p3380_p0 = pnand %p3378_p11, %p3364_p8  ;;  %p3386_p12 = scmp.lt.s32.totalorder %s3384_s26, %s3377_s22 }
  0x68   : > { %p3381_p3 = pneg %p3380_p0  ;;  %p3387_p1 = por %p3386_p12, %p3385_p10 }
  0x6a   : > { %p3388_p2 = pnand %p3387_p1, %p3381_p3 }
  0x6c   : > { %3391 = shalt.err (!%p3388_p2)
}
  0x6d   : > { %s4062_s20 = smov 128   ;;  %p4063_p8 = scmp.ne.s32.totalorder %s4054_s17, 0 }
  0x6e   : > { %3193 = dma.hbm_to_vmem [thread:$0]  (!%p4061_p7), %s3671_s19, 512, %s3676_s7, %s3678_s30, %s4062_s20, %s4062_s20, %s3484_s18  }
  0x6f   : > { %413 = sbr.rel (%p4063_p8) target bundleno = 4342 (0x10f6), region = 56  ;;  %p4064_p13 = scmp.eq.s32.totalorder (!%p4063_p8), %s3579_s15, 0 }
  0x76   : > { %3443 = dma.done.wait (%p4064_p13), [#allocation4], 256   ;;  %p4065_p4 = pmov %p4064_p13 }
  0x78   : > { %3445 = vsyncadd (%p4065_p4), [#allocation4], 4294967040  ;;  %p4066_p5 = pmov %p4065_p4 }
  0x79   : > { %p4067_p6 = pmov %p4065_p4 }
  0x7a   : > { %3447 = dma.done.wait (%p4066_p5), [#allocation7], 256  }
  0x7b   : > { %3449 = vsyncadd (%p4067_p6), [#allocation7], 4294967040  ;;  %s423_s21 = sand.u32 1, %s3579_s15   ;;  %s425_s30 = sand.u32 1, %s3464_s10  }
  0x7c   : > { %s2834_s18 = sshll.u32 %s425_s30, 5  ;;  %s424_s17 = scalar_lea.sflag [#allocation4], %s423_s21 }
  0x7d   : > { %s3721_s19 = scalar_lea.vmem [#allocation8], %s2834_s18  ;;  %p4068_p7 = scmp.ne.s32.totalorder %s4053_s16, 0 }
  0x7f   : > { %3451 = dma.done.wait (%p4068_p7), %s424_s17, 512  }
  0x80   : > { %3453 = vsyncadd (%p4068_p7), %s424_s17, 4294966784  ;;  %p487_p9 = scmp.lt.s32.totalorder %s3472_s12, 1  ;;  %s4069_s2 = sld [smem:[#allocation17_spill]] }
  0x81   : > { %s4070_s24 = sld [smem:[#allocation20_spill]]  ;;  %s4071_s23 = sld [smem:[#allocation19_spill]] }
  0x82   : > { %s3729_s7 = scalar_select %p487_p9, %s3472_s12, 1 }
  0x83   : > { %p2845_p11 = scmp.ne.s32.totalorder %s3472_s12, 0 }
  0x84   : > { %s2894_s27 = sshll.u32 %s3729_s7, 5  ;;  %s2897_s28 = sshll.u32 %s3729_s7, 6  ;;  %v520_v0 = vld [vmem:[#allocation3] sm:$0xff] (!%p2845_p11)  ;;  %vm522_vm0 = vcmask (!%p2845_p11), 261120   ;;  %v521_v1 = vld [vmem:[#allocation3 + $0x8] sm:$0xff] (!%p2845_p11) }
  0x85   : > { %s3739_s16 = scalar_lea.vmem %s4032_s3, %s2894_s27  ;;  %s3744_s21 = scalar_lea.vmem %s4033_s4, %s2894_s27  ;;  %523 = vst.msk [vmem:[#allocation2] sm:$0xff] (!%p2845_p11), %vm522_vm0, %v520_v0  ;;  %524 = vst.msk [vmem:[#allocation2 + $0x8] sm:$0xff] (!%p2845_p11), %vm522_vm0, %v521_v1 }
  0x86   : > { %s491_s22 = scalar_lea.vmem %s4069_s2, %s2894_s27  ;;  %s3749_s17 = scalar_lea.vmem %s4035_s6, %s2897_s28 }
  0x87   : > { %s2898_s0 = sshll.u32 %s3729_s7, 4  ;;  %s514_s29 = scalar_lea.vmem %s4070_s24, %s3729_s7 }
  0x88   : > { %s3759_s25 = scalar_lea.vmem %s4071_s23, %s2898_s0  ;;  %519 = sbr.rel (%p2845_p11) target bundleno = 143 (0x8f), region = 72 }
  0x8f PF: > { %v529_v2 = vld [vmem:[%s491_s22] sm:$0xff]  ;;  %v530_v3 = vld [vmem:[%s491_s22 + $0x8] sm:$0xff]  ;;  %v531_v4 = vld [vmem:[%s491_s22 + $0x10] sm:$0xff]  ;;  %v640_v5 = vlaneseq  ;;  %vm558_vm1 = vcmask 261120   ;;  %s3487_s0 = smov 32   ;;  %v3488_v24 = vmov 0.0  }
  0x90   : > { %v3123_v6 = vpack.c.bf16 %v530_v3, %v529_v2  ;;  %v532_v7 = vld [vmem:[%s491_s22 + $0x18] sm:$0xff]  ;;  %v3762_v8 = vld [vmem:[#allocation2] sm:$0xff]  ;;  %v3771_v14 = vld [vmem:[#allocation2 + $0x8] sm:$0xff]  ;;  %2993 = vmatprep.subr.mxu0 %v3488_v24  ;;  %vm3489_vm2 = vmmov 0   ;;  %s3490_s1 = smov 96   ;;  %vm746_vm3 = vcmask 64512  }
  0x91   : > { %v527_v9 = vld [vmem:[#allocation6] sm:$0xff]  ;;  %v3127_v10 = vpack.c.bf16 %v532_v7, %v531_v4  ;;  %v3765_v12 = vshrl.u32 %v640_v5, 7  ;;  %v528_v15 = vld [vmem:[#allocation6 + $0x8] sm:$0xff]  ;;  %v535_v21 = vld [vmem:[%s3739_s16 + $0x10] sm:$0xff]  ;;  %2995 = vmatprep.mubr.msk.f32.mxu0 %vm3489_vm2, %v3488_v24  ;;  %s3491_s2 = smov 120   ;;  %s3492_s5 = smov 88  }
  0x92   : > { %v556_v11 = vadd.f32 %v527_v9, %v3762_v8  ;;  %3124 = vmatprep.subr.bf16.mxu1 %v3123_v6  ;;  %v3768_v13 = vld [vmem:[%s3759_s25] sm:$0xff]  ;;  %v557_v18 = vadd.f32 %v528_v15, %v3771_v14  ;;  %v534_v20 = vld [vmem:[%s3739_s16 + $0x8] sm:$0xff]  ;;  %v536_v23 = vld [vmem:[%s3739_s16 + $0x18] sm:$0xff]  ;;  %s3493_s9 = smov 80   ;;  %s3494_s27 = smov 112   ;;  %vm2528_vm4 = vcmask 523264  }
  0x93   : > { %3126 = vmatpush3.bf16.msra.mxu1 %v3123_v6  ;;  %v648_v16 = vsub.s32 1, %v3765_v12  ;;  %v533_v19 = vld [vmem:[%s3739_s16] sm:$0xff]  ;;  %v3135_v25 = vpack.c.bf16 %v536_v23, %v535_v21  ;;  %v642_v33 = vsub.s32 0, %v3765_v12  ;;  %v658_v34 = vsub.s32 2, %v3765_v12  ;;  %s3495_s28 = smov 72   ;;  %s3496_s22 = smov 104  }
  0x94   : > { %2979 = vmatprep.mubr.msk.f32.mxu1 %vm558_vm1, %v556_v11  ;;  %3128 = vmatprep.subr.bf16.mxu1 %v3127_v10  ;;  %v3131_v22 = vpack.c.bf16 %v534_v20, %v533_v19  ;;  %p2888_p0 = scmp.ne.s32.totalorder %s3472_s12, 1 }
  0x95   : > { %v649_v17 = vrot.slane %v3768_v13, %v648_v16  ;;  %v643_v35 = vrot.slane %v3768_v13, %v642_v33  ;;  %v659_v36 = vrot.slane %v3768_v13, %v658_v34 }
  0x97   : > { %3130 = vmatpush3.bf16.msra.mxu1 %v3127_v10  ;;  %651 = vrot.lane.b32.xlu0 %v649_v17, %s3487_s0 }
  0x98   : > { %3132 = vmatprep.subr.bf16.mxu1 %v3131_v22 }
  0x9a   : > { %2980 = vmatmul.mubr.msk.f32.vlgmr.msra.gmra.mrb[0].mxu1 %vm558_vm1, %v557_v18 }
  0x9b   : > { %2990 = vmatprep.mubr.msk.f32.mxu1 %vm558_vm1, %v3762_v8  ;;  %3134 = vmatpush3.bf16.msra.mxu1 %v3131_v22 }
  0x9c   : > { %3136 = vmatprep.subr.bf16.mxu1 %v3135_v25 }
  0x9f   : > { %3138 = vmatpush3.bf16.msra.mxu1 %v3135_v25 }
  0xa0   : > { %2998 = vmatprep.subr.mxu1 %v3488_v24 }
  0xa2   : > { %2991 = vmatmul.mubr.msk.f32.vlgmr.msra.gmra.mrb[2].mxu1 %vm558_vm1, %v3771_v14 }
  0xa3   : > { %3000 = vmatprep.mubr.msk.f32.mxu1 %vm3489_vm2, %v3488_v24 }
 0x109   : > { %v652_v26 = vpop.permute.xlu0 %651 }
 0x16d   : > { %v2981_v27 = vpop.f32.mrb[0].mxu1 }
 0x16e   : > { %v3791_v28 = vadd.f32 %v2981_v27, %v652_v26  ;;  %v631_v29 = vpop.f32.mrb[1].mxu1  ;;  %v645_v37 = vadd.f32 %v2981_v27, %v643_v35 }
 0x16f   : > { %v3793_v30 = vadd.f32 %v652_v26, %v631_v29  ;;  %v644_v38 = vadd.f32 %v643_v35, %v631_v29 }
 0x170   : > { %823 = vrot.lane.b32.xlu0 %v3791_v28, %s3490_s1  ;;  %v3804_v42 = vmul.f32 0.35355338, %v645_v37 }
 0x171   : > { %744 = vrot.lane.b32.xlu1 %v3793_v30, %s3490_s1  ;;  %v3810_v44 = vmul.f32 0.35355338, %v644_v38 }
 0x175   : > { %v2992_v31 = vpop.f32.mrb[2].mxu1 }
 0x176   : > { %v732_v32 = vpop.f32.mrb[3].mxu1  ;;  %v3802_v41 = vadd.f32 %v2992_v31, %v659_v36 }
 0x177   : > { %v3807_v43 = vadd.f32 %v732_v32, %v659_v36 }
 0x1e2   : > { %v824_v39 = vpop.permute.xlu0 %823 }
 0x1e3   : > { %2999 = vmatpush3.xpose.msk.msra.mxu1 %vm746_vm3, %v824_v39  ;;  %v745_v40 = vpop.permute.xlu1 %744 }
 0x1e4   : > { %2994 = vmatpush3.xpose.msk.msra.mxu0 %vm746_vm3, %v745_v40  ;;  %3008 = vmatprep.subr.mxu1 %v3488_v24 }
 0x1e5   : > { %3003 = vmatprep.subr.mxu0 %v3488_v24 }
 0x1e6   : > { %3001 = vmatmul.mubr.msk.f32.vlgmr.msra.gmra.mrb[4].mxu1 %vm746_vm3, %v3804_v42 }
 0x1e7   : > { %2996 = vmatmul.mubr.msk.f32.vlgmr.msra.gmra.mrb[0].mxu0 %vm746_vm3, %v3810_v44  ;;  %3009 = vmatpush3.msra.mxu1 %v3802_v41 }
 0x1e8   : > { %3004 = vmatpush3.msra.mxu0 %v3807_v43  ;;  %3010 = vmatprep.mubr.msk.f32.mxu1 %vm3489_vm2, %v3488_v24 }
 0x1e9   : > { %3018 = vmatprep.subr.mxu1 %v3488_v24  ;;  %3005 = vmatprep.mubr.msk.f32.mxu0 %vm3489_vm2, %v3488_v24 }
 0x1ea   : > { %3013 = vmatprep.subr.mxu0 %v3488_v24 }
 0x2b9   : > { %v896_v45 = vpop.f32.mrb[4].mxu1 }
 0x2ba   : > { %v818_v46 = vpop.f32.mrb[0].mxu0  ;;  %v3002_v47 = vpop.f32.mrb[5].mxu1  ;;  %v903_v48 = vsel %vm746_vm3, %v896_v45, -inf }
 0x2bb   : > { %904 = vmax.xlane.f32.xlu1 %v903_v48  ;;  %v2997_v49 = vpop.f32.mrb[1].mxu0  ;;  %v900_v50 = vsel %vm746_vm3, %v818_v46, -inf }
 0x2cc   : > { %1146 = vrot.lane.b32.xlu1 %v3804_v42, %s3491_s2 }
 0x2f0   : > { %901 = vmax.xlane.f32.xlu1 %v900_v50 }
 0x301   : > { %1068 = vrot.lane.b32.xlu1 %v3810_v44, %s3491_s2 }
 0x348   : > { %v905_v51 = vpop.xlane.xlu1 %904 }
 0x349   : > { %v907_v52 = vsub.f32 %v896_v45, %v905_v51 }
 0x34b   : > { %v910_v53 = vmul.f32 1.442695, %v907_v52 }
 0x34c   : > { %v1147_v56 = vpop.permute.xlu1 %1146 }
 0x34d   : > { %3266 = vpow2.f32 %v910_v53 }
 0x357   : > { %v3267_v54 = vpop.eup %3266 }
 0x358   : > { %v915_v55 = vsel %vm746_vm3, %v3267_v54, 0.0 }
 0x359   : > { %916 = vadd.xlane.f32.xlu0 %v915_v55  ;;  %v538_v55 = vld [vmem:[%s3744_s21 + $0x8] sm:$0xff] }
 0x36f   : > { %1148 = vrot.lane.b32.xlu0 %v3791_v28, %s3492_s5 }
 0x37d   : > { %v902_v57 = vpop.xlane.xlu1 %901 }
 0x37e   : > { %v906_v58 = vsub.f32 %v818_v46, %v902_v57 }
 0x380   : > { %v908_v59 = vmul.f32 1.442695, %v906_v58 }
 0x381   : > { %v1069_v6 = vpop.permute.xlu1 %1068 }
 0x382   : > { %3268 = vpow2.f32 %v908_v59 }
 0x38c   : > { %v3269_v60 = vpop.eup %3268 }
 0x38d   : > { %v912_v61 = vsel %vm746_vm3, %v3269_v60, 0.0 }
 0x38e   : > { %913 = vadd.xlane.f32.xlu0 %v912_v61 }
 0x3a4   : > { %1070 = vrot.lane.b32.xlu0 %v3793_v30, %s3492_s5 }
 0x3e6   : > { %v917_v62 = vpop.xlane.xlu0 %916 }
 0x3e7   : > { %3270 = vrcp.f32 %v917_v62 }
 0x3ea   : > { %v1149_v1 = vpop.permute.xlu0 %1148 }
 0x3f1   : > { %v3271_v63 = vpop.eup %3270 }
 0x3f2   : > { %v921_v0 = vmul.f32 %v3271_v63, %v3267_v54 }
 0x3f4   : > { %3011 = vmatmul.mubr.msk.f32.vlgmr.msra.gmra.mrb[6].mxu1 %vm746_vm3, %v921_v0 }
 0x3f5   : > { %3019 = vmatpush3.xpose.msk.msra.mxu1 %vm746_vm3, %v1149_v1  ;;  %3020 = vmatprep.mubr.msk.f32.mxu1 %vm3489_vm2, %v3488_v24 }
 0x3f6   : > { %3028 = vmatprep.subr.mxu1 %v3488_v24 }
 0x3f8   : > { %3021 = vmatmul.mubr.msk.f32.vlgmr.msra.gmra.mrb[8].mxu1 %vm746_vm3, %v1147_v56  ;;  %v537_v56 = vld [vmem:[%s3744_s21] sm:$0xff] }
 0x3f9   : > { %3030 = vmatprep.mubr.msk.f32.mxu1 %vm3489_vm2, %v3488_v24 }
 0x41b   : > { %v914_v2 = vpop.xlane.xlu0 %913 }
 0x41c   : > { %3272 = vrcp.f32 %v914_v2 }
 0x41f   : > { %v1071_v5 = vpop.permute.xlu0 %1070 }
 0x426   : > { %v3273_v3 = vpop.eup %3272 }
 0x427   : > { %v920_v4 = vmul.f32 %v3273_v3, %v3269_v60 }
 0x429   : > { %3006 = vmatmul.mubr.msk.f32.vlgmr.msra.gmra.mrb[2].mxu0 %vm746_vm3, %v920_v4 }
 0x42a   : > { %3014 = vmatpush3.xpose.msk.msra.mxu0 %vm746_vm3, %v1071_v5  ;;  %3015 = vmatprep.mubr.msk.f32.mxu0 %vm3489_vm2, %v3488_v24 }
 0x42b   : > { %3023 = vmatprep.subr.mxu0 %v3488_v24 }
 0x42d   : > { %3016 = vmatmul.mubr.msk.f32.vlgmr.msra.gmra.mrb[4].mxu0 %vm746_vm3, %v1069_v6 }
 0x42e   : > { %3025 = vmatprep.mubr.msk.f32.mxu0 %vm3489_vm2, %v3488_v24 }
 0x4c7   : > { %v3851_v7 = vpop.f32.mrb[6].mxu1 }
 0x4c8   : > { %v3012_v9 = vpop.f32.mrb[7].mxu1 }
 0x4c9   : > { %v539_v9 = vld [vmem:[%s3744_s21 + $0x10] sm:$0xff] }
 0x4cb   : > { %v1220_v10 = vpop.f32.mrb[8].mxu1 }
 0x4cc   : > { %v3022_v11 = vpop.f32.mrb[9].mxu1  ;;  %v1227_v15 = vsel %vm746_vm3, %v1220_v10, -inf }
 0x4cd   : > { %1228 = vmax.xlane.f32.xlu1 %v1227_v15 }
 0x4de   : > { %1564 = vrot.lane.b32.xlu1 %v3793_v30, %s3493_s9 }
 0x4e2   : > { %1562 = vrot.lane.b32.xlu1 %v3810_v44, %s3494_s27 }
 0x4e6   : > { %1640 = vrot.lane.b32.xlu1 %v3804_v42, %s3494_s27 }
 0x4fc   : > { %v3859_v16 = vpop.f32.mrb[2].mxu0 }
 0x4fd   : > { %v3007_v17 = vpop.f32.mrb[3].mxu0 }
 0x500   : > { %v1142_v18 = vpop.f32.mrb[4].mxu0 }
 0x501   : > { %v3017_v19 = vpop.f32.mrb[5].mxu0  ;;  %v1224_v26 = vsel %vm746_vm3, %v1142_v18, -inf }
 0x55a   : > { %v1229_v20 = vpop.xlane.xlu1 %1228 }
 0x55b   : > { %v1231_v21 = vsub.f32 %v1220_v10, %v1229_v20 }
 0x55d   : > { %v1234_v22 = vmul.f32 1.442695, %v1231_v21 }
 0x55e   : > { %v1565_v31 = vpop.permute.xlu1 %1564 }
 0x55f   : > { %3274 = vpow2.f32 %v1234_v22 }
 0x569   : > { %v3275_v23 = vpop.eup %3274 }
 0x56a   : > { %v1239_v25 = vsel %vm746_vm3, %v3275_v23, 0.0 }
 0x56b   : > { %1240 = vadd.xlane.f32.xlu0 %v1239_v25 }
 0x581   : > { %1324 = vrot.lane.b32.xlu0 %v3802_v41, %s3491_s2 }
 0x585   : > { %1642 = vrot.lane.b32.xlu0 %v3791_v28, %s3493_s9 }
 0x5a4   : > { %1225 = vmax.xlane.f32.xlu0 %v1224_v26 }
 0x5ba   : > { %1247 = vrot.lane.b32.xlu0 %v3807_v43, %s3491_s2 }
 0x5be   : > { %1816 = vrot.lane.b32.xlu0 %v3802_v41, %s3494_s27 }
 0x5c2   : > { %1977 = vrot.lane.b32.xlu0 %v3793_v30, %s3495_s28  ;;  %v1563_v30 = vpop.permute.xlu1 %1562 }
 0x5c6   : > { %2055 = vrot.lane.b32.xlu0 %v3791_v28, %s3495_s28  ;;  %v1641_v34 = vpop.permute.xlu1 %1640 }
 0x5ca   : > { %1975 = vrot.lane.b32.xlu0 %v3810_v44, %s3496_s22 }
 0x5ce   : > { %2053 = vrot.lane.b32.xlu0 %v3804_v42, %s3496_s22 }
 0x5f8   : > { %v1241_v27 = vpop.xlane.xlu0 %1240 }
 0x5f9   : > { %3276 = vrcp.f32 %v1241_v27 }
 0x5fc   : > { %v1325_v29 = vpop.permute.xlu0 %1324 }
 0x5fd   : > { %3029 = vmatpush3.msra.mxu1 %v1325_v29 }
 0x5fe   : > { %3043 = vmatprep.subr.mxu1 %v3488_v24 }
 0x600   : > { %v1643_v28 = vpop.permute.xlu0 %1642 }
 0x603   : > { %v3277_v32 = vpop.eup %3276 }
 0x604   : > { %v1245_v33 = vmul.f32 %v3277_v32, %v3275_v23 }
 0x606   : > { %3031 = vmatmul.mubr.msk.f32.vlgmr.msra.gmra.mrb[10].mxu1 %vm746_vm3, %v1245_v33 }
 0x607   : > { %3044 = vmatpush3.xpose.msk.msra.mxu1 %vm746_vm3, %v1565_v31  ;;  %3045 = vmatprep.mubr.msk.f32.mxu1 %vm3489_vm2, %v3488_v24 }
 0x608   : > { %3048 = vmatprep.subr.mxu1 %v3488_v24 }
 0x60a   : > { %3046 = vmatmul.mubr.msk.f32.vlgmr.msra.gmra.mrb[12].mxu1 %vm746_vm3, %v1563_v30 }
 0x60b   : > { %3049 = vmatpush3.xpose.msk.msra.mxu1 %vm746_vm3, %v1643_v28  ;;  %3050 = vmatprep.mubr.msk.f32.mxu1 %vm3489_vm2, %v3488_v24 }
 0x60c   : > { %3058 = vmatprep.subr.mxu1 %v3488_v24 }
 0x60e   : > { %3051 = vmatmul.mubr.msk.f32.vlgmr.msra.gmra.mrb[14].mxu1 %vm746_vm3, %v1641_v34 }
 0x60f   : > { %3060 = vmatprep.mubr.msk.f32.mxu1 %vm3489_vm2, %v3488_v24 }
 0x631   : > { %v1226_v35 = vpop.xlane.xlu0 %1225 }
 0x632   : > { %v1230_v36 = vsub.f32 %v1142_v18, %v1226_v35 }
 0x634   : > { %v1232_v37 = vmul.f32 1.442695, %v1230_v36 }
 0x635   : > { %v1248_v38 = vpop.permute.xlu0 %1247 }
 0x636   : > { %3278 = vpow2.f32 %v1232_v37  ;;  %3024 = vmatpush3.msra.mxu0 %v1248_v38 }
 0x637   : > { %3033 = vmatprep.subr.mxu0 %v538_v55 }
 0x639   : > { %v1817_v39 = vpop.permute.xlu0 %1816 }
 0x63a   : > { %3059 = vmatpush3.msra.mxu1 %v1817_v39 }
 0x63b   : > { %3068 = vmatprep.subr.mxu1 %v3488_v24 }
 0x63d   : > { %v1978_v11 = vpop.permute.xlu0 %1977 }
 0x640   : > { %v3279_v40 = vpop.eup %3278 }
 0x641   : > { %v1236_v42 = vsel %vm746_vm3, %v3279_v40, 0.0  ;;  %v2056_v18 = vpop.permute.xlu0 %2055 }
 0x642   : > { %1237 = vadd.xlane.f32.xlu1 %v1236_v42 }
 0x645   : > { %v1976_v19 = vpop.permute.xlu0 %1975 }
 0x649   : > { %v2054_v25 = vpop.permute.xlu0 %2053 }
 0x6cf   : > { %v1238_v44 = vpop.xlane.xlu1 %1237 }
 0x6d0   : > { %3280 = vrcp.f32 %v1238_v44 }
 0x6d9   : > { %v1396_v45 = vpop.f32.mrb[10].mxu1 }
 0x6da   : > { %v3281_v46 = vpop.eup %3280  ;;  %v3032_v47 = vpop.f32.mrb[11].mxu1 }
 0x6db   : > { %v1244_v48 = vmul.f32 %v3281_v46, %v3279_v40  ;;  %v540_v47 = vld [vmem:[%s3744_s21 + $0x18] sm:$0xff] }
 0x6dd   : > { %3026 = vmatmul.mubr.msk.f32.vlgmr.msra.gmra.mrb[6].mxu0 %vm746_vm3, %v1244_v48  ;;  %v1636_v49 = vpop.f32.mrb[12].mxu1 }
 0x6de   : > { %v3047_v50 = vpop.f32.mrb[13].mxu1  ;;  %v1718_v51 = vsel %vm746_vm3, %v1636_v49, -inf  ;;  %3034 = vmatpush3.msra.mxu0 %v538_v55 }
 0x6df   : > { %1719 = vmax.xlane.f32.xlu1 %v1718_v51  ;;  %3038 = vmatprep.subr.mxu0 %v537_v56 }
 0x6e1   : > { %v1714_v52 = vpop.f32.mrb[14].mxu1 }
 0x6e2   : > { %v3052_v53 = vpop.f32.mrb[15].mxu1  ;;  %v1721_v54 = vsel %vm746_vm3, %v1714_v52, -inf }
 0x6e3   : > { %1722 = vmax.xlane.f32.xlu1 %v1721_v54 }
 0x76c   : > { %v1720_v57 = vpop.xlane.xlu1 %1719 }
 0x76d   : > { %v1724_v58 = vsub.f32 %v1636_v49, %v1720_v57 }
 0x76f   : > { %v1726_v59 = vmul.f32 1.442695, %v1724_v58 }
 0x770   : > { %v1723_v60 = vpop.xlane.xlu1 %1722 }
 0x771   : > { %3282 = vpow2.f32 %v1726_v59  ;;  %v1725_v61 = vsub.f32 %v1714_v52, %v1723_v60 }
 0x773   : > { %v1728_v62 = vmul.f32 1.442695, %v1725_v61 }
 0x775   : > { %3284 = vpow2.f32 %v1728_v62 }
 0x77b   : > { %v3283_v63 = vpop.eup %3282 }
 0x77c   : > { %v1730_v0 = vsel %vm746_vm3, %v3283_v63, 0.0 }
 0x77d   : > { %1731 = vadd.xlane.f32.xlu1 %v1730_v0 }
 0x77f   : > { %v3285_v1 = vpop.eup %3284 }
 0x780   : > { %v1733_v2 = vsel %vm746_vm3, %v3285_v1, 0.0 }
 0x781   : > { %1734 = vadd.xlane.f32.xlu1 %v1733_v2 }
 0x792   : > { %1740 = vrot.lane.b32.xlu1 %v3807_v43, %s3494_s27 }
 0x7b0   : > { %v1319_v3 = vpop.f32.mrb[6].mxu0 }
 0x7b1   : > { %v3027_v4 = vpop.f32.mrb[7].mxu0  ;;  %3035 = vmatprep.mubr.msk.f32.mxu0 %vm746_vm3, %v1319_v3 }
 0x7b2   : > { %3036 = vmatmul.mubr.msk.f32.vlgmr.msra.gmra.mrb[8].mxu0 %vm746_vm3, %v1396_v45 }
 0x7b3   : > { %3040 = vmatprep.mubr.msk.f32.mxu0 %vm746_vm3, %v3859_v16  ;;  %3039 = vmatpush3.msra.mxu0 %v537_v56 }
 0x7b4   : > { %3053 = vmatprep.subr.mxu0 %v3488_v24 }
 0x7ba   : > { %3041 = vmatmul.mubr.msk.f32.vlgmr.msra.gmra.mrb[8].mxu0 %vm746_vm3, %v3851_v7 }
 0x7bb   : > { %3055 = vmatprep.mubr.msk.f32.mxu0 %vm3489_vm2, %v3488_v24 }
 0x80a   : > { %v1732_v5 = vpop.xlane.xlu1 %1731 }
 0x80b   : > { %3286 = vrcp.f32 %v1732_v5 }
 0x80e   : > { %v1735_v6 = vpop.xlane.xlu1 %1734 }
 0x80f   : > { %3288 = vrcp.f32 %v1735_v6 }
 0x812   : > { %v1741_v10 = vpop.permute.xlu1 %1740 }
 0x813   : > { %3054 = vmatpush3.msra.mxu0 %v1741_v10  ;;  %v541_v10 = vld [vmem:[%s3721_s19] sm:$0xff] }
 0x814   : > { %3063 = vmatprep.subr.mxu0 %v539_v9 }
 0x815   : > { %v3287_v15 = vpop.eup %3286 }
 0x816   : > { %v1738_v16 = vmul.f32 %v3287_v15, %v3283_v63 }
 0x818   : > { %3056 = vmatmul.mubr.msk.f32.vlgmr.msra.gmra.mrb[10].mxu0 %vm746_vm3, %v1738_v16  ;;  %v543_v16 = vld [vmem:[%s3721_s19 + $0x10] sm:$0xff] }
 0x819   : > { %v3289_v17 = vpop.eup %3288  ;;  %3064 = vmatpush3.msra.mxu0 %v539_v9 }
 0x81a   : > { %v1739_v7 = vmul.f32 %v3289_v17, %v3285_v1  ;;  %3073 = vmatprep.subr.mxu0 %v3488_v24  ;;  %v544_v17 = vld [vmem:[%s3721_s19 + $0x18] sm:$0xff] }
 0x81c   : > { %3061 = vmatmul.mubr.msk.f32.vlgmr.msra.gmra.mrb[16].mxu1 %vm746_vm3, %v1739_v7  ;;  %v545_v7 = vld [vmem:[%s3749_s17] sm:$0xff] }
 0x81d   : > { %3069 = vmatpush3.xpose.msk.msra.mxu1 %vm746_vm3, %v1978_v11  ;;  %3070 = vmatprep.mubr.msk.f32.mxu1 %vm3489_vm2, %v3488_v24  ;;  %v542_v11 = vld [vmem:[%s3721_s19 + $0x8] sm:$0xff] }
 0x81e   : > { %3078 = vmatprep.subr.mxu1 %v3488_v24  ;;  %v3139_v15 = vpack.c.bf16 %v542_v11, %v541_v10 }
 0x820   : > { %3071 = vmatmul.mubr.msk.f32.vlgmr.msra.gmra.mrb[18].mxu1 %vm746_vm3, %v1976_v19  ;;  %v546_v19 = vld [vmem:[%s3749_s17 + $0x8] sm:$0xff] }
 0x821   : > { %3080 = vmatprep.mubr.msk.f32.mxu1 %vm3489_vm2, %v3488_v24 }
 0x8eb   : > { %v1812_v20 = vpop.f32.mrb[10].mxu0 }
 0x8ec   : > { %v3057_v21 = vpop.f32.mrb[11].mxu0  ;;  %3065 = vmatprep.mubr.msk.f32.mxu0 %vm746_vm3, %v1812_v20  ;;  %v547_v20 = vld [vmem:[%s3749_s17 + $0x10] sm:$0xff] }
 0x8ed   : > { %v3147_v21 = vpack.c.bf16 %v546_v19, %v545_v7  ;;  %v2640_v19 = vsub.s32 7, %v3765_v12 }
 0x8ef   : > { %v1888_v22 = vpop.f32.mrb[16].mxu1 }
 0x8f0   : > { %v3062_v23 = vpop.f32.mrb[17].mxu1  ;;  %3066 = vmatmul.mubr.msk.f32.vlgmr.msra.gmra.mrb[8].mxu0 %vm746_vm3, %v1888_v22  ;;  %v548_v22 = vld [vmem:[%s3749_s17 + $0x18] sm:$0xff] }
 0x8f1   : > { %3074 = vmatpush3.xpose.msk.msra.mxu0 %vm746_vm3, %v2056_v18  ;;  %3075 = vmatprep.mubr.msk.f32.mxu0 %vm3489_vm2, %v3488_v24  ;;  %v3143_v18 = vpack.c.bf16 %v544_v17, %v543_v16  ;;  %v3151_v23 = vpack.c.bf16 %v548_v22, %v547_v20  ;;  %v2641_v20 = vrot.slane %v3768_v13, %v2640_v19 }
 0x8f2   : > { %3083 = vmatprep.subr.mxu0 %v3488_v24 }
 0x8f3   : > { %v2049_v26 = vpop.f32.mrb[18].mxu1 }
 0x8f4   : > { %v3072_v27 = vpop.f32.mrb[19].mxu1  ;;  %3076 = vmatmul.mubr.msk.f32.vlgmr.msra.gmra.mrb[12].mxu0 %vm746_vm3, %v2054_v25  ;;  %v2131_v29 = vsel %vm746_vm3, %v2049_v26, -inf  ;;  %v549_v25 = vld [vmem:[%s3749_s17 + $0x20] sm:$0xff] }
 0x8f5   : > { %2132 = vmax.xlane.f32.xlu1 %v2131_v29  ;;  %3085 = vmatprep.mubr.msk.f32.mxu0 %vm3489_vm2, %v3488_v24 }
 0x982   : > { %v2133_v31 = vpop.xlane.xlu1 %2132 }
 0x983   : > { %v2137_v32 = vsub.f32 %v2049_v26, %v2133_v31  ;;  %v550_v26 = vld [vmem:[%s3749_s17 + $0x28] sm:$0xff] }
 0x984   : > { %v3155_v27 = vpack.c.bf16 %v550_v26, %v549_v25  ;;  %v2887_v25 = vld [vmem:[%s3759_s25 + $0x8] ss:$0 sm:$0xff] }
 0x985   : > { %v2139_v33 = vmul.f32 1.442695, %v2137_v32 }
 0x987   : > { %3290 = vpow2.f32 %v2139_v33 }
 0x991   : > { %v3291_v35 = vpop.eup %3290 }
 0x992   : > { %v2143_v36 = vsel %vm746_vm3, %v3291_v35, 0.0 }
 0x9c7   : > { %v2127_v30 = vpop.f32.mrb[12].mxu0 }
 0x9c8   : > { %v3077_v28 = vpop.f32.mrb[13].mxu0  ;;  %v2134_v34 = vsel %vm746_vm3, %v2127_v30, -inf }
 0x9c9   : > { %2135 = vmax.xlane.f32.xlu0 %v2134_v34  ;;  %v2425_v34 = vsub.s32 5, %v3765_v12 }
 0x9cd   : > { %2144 = vadd.xlane.f32.xlu0 %v2143_v36  ;;  %v2426_v36 = vrot.slane %v3768_v13, %v2425_v34 }
 0x9e3   : > { %2153 = vrot.lane.b32.xlu0 %v3807_v43, %s3496_s22 }
 0xa56   : > { %v2136_v37 = vpop.xlane.xlu0 %2135 }
 0xa57   : > { %v2138_v38 = vsub.f32 %v2127_v30, %v2136_v37 }
 0xa59   : > { %v2141_v24 = vmul.f32 1.442695, %v2138_v38 }
 0xa5a   : > { %v2145_v39 = vpop.xlane.xlu0 %2144 }
 0xa5b   : > { %3292 = vpow2.f32 %v2141_v24 }
 0xa5c   : > { %3294 = vrcp.f32 %v2145_v39 }
 0xa5e   : > { %v2154_v40 = vpop.permute.xlu0 %2153 }
 0xa5f   : > { %3079 = vmatpush3.msra.mxu1 %v2154_v40 }
 0xa60   : > { %3140 = vmatprep.subr.bf16.mxu1 %v3139_v15 }
 0xa65   : > { %v3293_v42 = vpop.eup %3292 }
 0xa66   : > { %v3295_v44 = vpop.eup %3294  ;;  %v2146_v45 = vsel %vm746_vm3, %v3293_v42, 0.0 }
 0xa67   : > { %v2151_v46 = vmul.f32 %v3295_v44, %v3291_v35  ;;  %2147 = vadd.xlane.f32.xlu1 %v2146_v45  ;;  %v2431_v35 = vsub.s32 6, %v3765_v12 }
 0xa69   : > { %3081 = vmatmul.mubr.msk.f32.vlgmr.msra.gmra.mrb[20].mxu1 %vm746_vm3, %v2151_v46  ;;  %v2432_v40 = vrot.slane %v3768_v13, %v2431_v35 }
 0xa6a   : > { %3142 = vmatpush3.bf16.msra.mxu1 %v3139_v15 }
 0xa6b   : > { %3144 = vmatprep.subr.bf16.mxu1 %v3143_v18 }
 0xa6e   : > { %3146 = vmatpush3.bf16.msra.mxu1 %v3143_v18 }
 0xa78   : > { %2229 = vrot.lane.b32.xlu1 %v3802_v41, %s3496_s22  ;;  %v2390_v41 = vsub.s32 3, %v3765_v12 }
 0xa7a   : > { %v2391_v55 = vrot.slane %v3768_v13, %v2390_v41 }
 0xaf4   : > { %v2148_v43 = vpop.xlane.xlu1 %2147 }
 0xaf5   : > { %3296 = vrcp.f32 %v2148_v43  ;;  %v551_v43 = vld [vmem:[%s3749_s17 + $0x30] sm:$0xff] }
 0xaf8   : > { %v2230_v48 = vpop.permute.xlu1 %2229 }
 0xaf9   : > { %3084 = vmatpush3.msra.mxu0 %v2230_v48 }
 0xafa   : > { %3088 = vmatprep.subr.mxu0 %v540_v47 }
 0xaff   : > { %v3297_v49 = vpop.eup %3296 }
 0xb00   : > { %v2152_v50 = vmul.f32 %v3297_v49, %v3293_v42  ;;  %v2882_v49 = vld [vmem:[%s514_s29] ss:$0 sm:$0xff] }
 0xb02   : > { %3086 = vmatmul.mubr.msk.f32.vlgmr.msra.gmra.mrb[14].mxu0 %vm746_vm3, %v2152_v50 }
 0xb03   : > { %3089 = vmatpush3.msra.mxu0 %v540_v47  ;;  %v552_v47 = vld [vmem:[%s3749_s17 + $0x38] sm:$0xff] }
 0xb04   : > { %3148 = vmatprep.subr.bf16.mxu0 %v3147_v21  ;;  %v3159_v48 = vpack.c.bf16 %v552_v47, %v551_v43 }
 0xb3c   : > { %v2225_v51 = vpop.f32.mrb[20].mxu1 }
 0xb3d   : > { %v3082_v52 = vpop.f32.mrb[21].mxu1  ;;  %3090 = vmatprep.mubr.msk.f32.mxu0 %vm746_vm3, %v2225_v51 }
 0xbd5   : > { %v2301_v53 = vpop.f32.mrb[14].mxu0 }
 0xbd6   : > { %v3087_v54 = vpop.f32.mrb[15].mxu0  ;;  %3091 = vmatmul.mubr.msk.f32.vlgmr.msra.gmra.mrb[8].mxu0 %vm746_vm3, %v2301_v53 }
 0xbd7   : > { %3150 = vmatpush3.bf16.msra.mxu0 %v3147_v21 }
 0xbd8   : > { %3152 = vmatprep.subr.bf16.mxu0 %v3151_v23 }
 0xbdb   : > { %3154 = vmatpush3.bf16.msra.mxu0 %v3151_v23 }
 0xbdc   : > { %3156 = vmatprep.subr.bf16.mxu0 %v3155_v27 }
 0xbdf   : > { %3158 = vmatpush3.bf16.msra.mxu0 %v3155_v27 }
 0xbe0   : > { %3160 = vmatprep.subr.bf16.mxu0 %v3159_v48 }
 0xbe3   : > { %3162 = vmatpush3.bf16.msra.mxu0 %v3159_v48 }
 0xca9   : > { %v3092_v56 = vpop.f32.mrb[8].mxu0 }
 0xcaa   : > { %v2393_v57 = vadd.f32 %v3092_v56, %v2391_v55  ;;  %v2377_v58 = vpop.f32.mrb[9].mxu0 }
 0xcab   : > { %v2392_v59 = vadd.f32 %v2391_v55, %v2377_v58  ;;  %v2526_v55 = vsub.s32 4, %v3765_v12 }
 0xcac   : > { %v2395_v60 = vadd.f32 %v2393_v57, %v3771_v14 }
 0xcad   : > { %v2394_v61 = vadd.f32 %v2392_v59, %v3762_v8  ;;  %v2527_v56 = vrot.slane %v3768_v13, %v2526_v55 }
 0xcae   : > { %v2399_v62 = vsel %vm558_vm1, %v2395_v60, 0.0 }
 0xcaf   : > { %2400 = vadd.xlane.f32.xlu0 %v2399_v62  ;;  %v2396_v63 = vsel %vm558_vm1, %v2394_v61, 0.0 }
 0xcb0   : > { %2397 = vadd.xlane.f32.xlu1 %v2396_v63 }
 0xd3c   : > { %v2401_v0 = vpop.xlane.xlu0 %2400 }
 0xd3d   : > { %v2404_v1 = vmul.f32 0.03125, %v2401_v0  ;;  %v2398_v2 = vpop.xlane.xlu1 %2397 }
 0xd3e   : > { %v2403_v3 = vmul.f32 0.03125, %v2398_v2 }
 0xd3f   : > { %v2406_v4 = vsub.f32 %v2395_v60, %v2404_v1 }
 0xd40   : > { %v2405_v5 = vsub.f32 %v2394_v61, %v2403_v3 }
 0xd41   : > { %v2408_v6 = vmul.f32 %v2406_v4, %v2406_v4 }
 0xd42   : > { %v2407_v14 = vmul.f32 %v2405_v5, %v2405_v5 }
 0xd43   : > { %v2412_v8 = vsel %vm558_vm1, %v2408_v6, 0.0 }
 0xd44   : > { %2413 = vadd.xlane.f32.xlu1 %v2412_v8  ;;  %v2409_v9 = vsel %vm558_vm1, %v2407_v14, 0.0 }
 0xd45   : > { %2410 = vadd.xlane.f32.xlu0 %v2409_v9 }
 0xdd1   : > { %v2414_v29 = vpop.xlane.xlu1 %2413 }
 0xdd2   : > { %v2416_v31 = vmul.f32 0.03125, %v2414_v29  ;;  %v2411_v32 = vpop.xlane.xlu0 %2410 }
 0xdd3   : > { %v2415_v33 = vmul.f32 0.03125, %v2411_v32 }
 0xdd4   : > { %v2418_v30 = vadd.f32 1e-05, %v2416_v31 }
 0xdd5   : > { %v2417_v28 = vadd.f32 1e-05, %v2415_v33 }
 0xdd6   : > { %3298 = vrsqrt.f32 %v2418_v30 }
 0xdd7   : > { %3300 = vrsqrt.f32 %v2417_v28 }
 0xde0   : > { %v3299_v37 = vpop.eup %3298 }
 0xde1   : > { %v3301_v38 = vpop.eup %3300  ;;  %v2422_v24 = vmul.f32 %v3299_v37, %v2406_v4 }
 0xde2   : > { %v2421_v39 = vmul.f32 %v3301_v38, %v2405_v5 }
 0xde3   : > { %v2428_v42 = vmul.f32 %v2426_v36, %v2422_v24 }
 0xde4   : > { %v2427_v44 = vmul.f32 %v2426_v36, %v2421_v39 }
 0xde5   : > { %v2434_v46 = vadd.f32 %v2432_v40, %v2428_v42 }
 0xde6   : > { %v2433_v45 = vadd.f32 %v2432_v40, %v2427_v44 }
 0xde8   : > { %3101 = vmatprep.mubr.msk.f32.mxu1 %vm558_vm1, %v2433_v45 }
 0xde9   : > { %3102 = vmatmul.mubr.msk.f32.vlgmr.msra.gmra.mrb[22].mxu1 %vm558_vm1, %v2434_v46 }
 0xebc   : > { %v3103_v50 = vpop.f32.mrb[22].mxu1 }
 0xebd   : > { %v2519_v51 = vadd.f32 %v3103_v50, %v2882_v49  ;;  %v2513_v52 = vpop.f32.mrb[23].mxu1 }
 0xebe   : > { %v2514_v53 = vadd.f32 %v2882_v49, %v2513_v52 }
 0xebf   : > { %v2523_v41 = vmax.f32 %v2519_v51, 0.0 }
 0xec0   : > { %v2522_v54 = vmax.f32 %v2514_v53, 0.0 }
 0xec2   : > { %3120 = vmatprep.mubr.msk.f32.mxu0 %vm2528_vm4, %v2522_v54 }
 0xec3   : > { %3121 = vmatmul.mubr.msk.f32.vlgmr.msra.gmra.mrb[16].mxu0 %vm2528_vm4, %v2523_v41 }
 0xf96   : > { %v3122_v57 = vpop.f32.mrb[16].mxu0 }
 0xf97   : > { %v2607_v58 = vadd.f32 %v3122_v57, %v2527_v56  ;;  %v2601_v59 = vpop.f32.mrb[17].mxu0 }
 0xf98   : > { %v2602_v60 = vadd.f32 %v2601_v59, %v2527_v56 }
 0xf99   : > { %v2611_v61 = vadd.f32 %v2607_v58, %v2434_v46 }
 0xf9a   : > { %v2610_v62 = vadd.f32 %v2602_v60, %v2433_v45 }
 0xf9b   : > { %v2615_v63 = vsel %vm558_vm1, %v2611_v61, 0.0 }
 0xf9c   : > { %2616 = vadd.xlane.f32.xlu1 %v2615_v63  ;;  %v2612_v0 = vsel %vm558_vm1, %v2610_v62, 0.0 }
 0xf9d   : > { %2613 = vadd.xlane.f32.xlu0 %v2612_v0 }
0x1029   : > { %v2617_v1 = vpop.xlane.xlu1 %2616 }
0x102a   : > { %v2619_v2 = vmul.f32 0.03125, %v2617_v1  ;;  %v2614_v3 = vpop.xlane.xlu0 %2613 }
0x102b   : > { %v2618_v4 = vmul.f32 0.03125, %v2614_v3 }
0x102c   : > { %v2621_v5 = vsub.f32 %v2611_v61, %v2619_v2 }
0x102d   : > { %v2620_v6 = vsub.f32 %v2610_v62, %v2618_v4 }
0x102e   : > { %v2623_v14 = vmul.f32 %v2621_v5, %v2621_v5 }
0x102f   : > { %v2622_v8 = vmul.f32 %v2620_v6, %v2620_v6 }
0x1030   : > { %v2627_v9 = vsel %vm558_vm1, %v2623_v14, 0.0 }
0x1031   : > { %2628 = vadd.xlane.f32.xlu1 %v2627_v9  ;;  %v2624_v10 = vsel %vm558_vm1, %v2622_v8, 0.0 }
0x1032   : > { %2625 = vadd.xlane.f32.xlu0 %v2624_v10 }
0x10be   : > { %v2629_v11 = vpop.xlane.xlu1 %2628 }
0x10bf   : > { %v2631_v15 = vmul.f32 0.03125, %v2629_v11  ;;  %v2626_v16 = vpop.xlane.xlu0 %2625 }
0x10c0   : > { %v2630_v17 = vmul.f32 0.03125, %v2626_v16 }
0x10c1   : > { %v2633_v18 = vadd.f32 1e-05, %v2631_v15 }
0x10c2   : > { %v2632_v7 = vadd.f32 1e-05, %v2630_v17 }
0x10c3   : > { %3302 = vrsqrt.f32 %v2633_v18 }
0x10c4   : > { %3304 = vrsqrt.f32 %v2632_v7 }
0x10cd   : > { %v3303_v21 = vpop.eup %3302 }
0x10ce   : > { %v3305_v22 = vpop.eup %3304  ;;  %v2637_v23 = vmul.f32 %v3303_v21, %v2621_v5 }
0x10cf   : > { %v2636_v26 = vmul.f32 %v3305_v22, %v2620_v6  ;;  %2655 = sbr.rel (%p2888_p0) target bundleno = 4310 (0x10d6), region = 76 }
0x10d0   : > { %v2643_v27 = vmul.f32 %v2641_v20, %v2637_v23 }
0x10d1   : > { %v2642_v29 = vmul.f32 %v2641_v20, %v2636_v26 }
0x10d2   : > { %v2649_v31 = vadd.f32 %v2887_v25, %v2643_v27 }
0x10d3   : > { %v2648_v32 = vadd.f32 %v2887_v25, %v2642_v29 }
0x10d4   : > { %2651 = vst.msk [vmem:[#allocation2 + $0x8] sm:$0xff] %vm558_vm1, %v2649_v31  ;;  %2657 = vst.msk [vmem:[#allocation9 + $0x8] sm:$0xff] (!%p2888_p0), %vm558_vm1, %v2649_v31 }
0x10d5   : > { %2650 = vst.msk [vmem:[#allocation2] sm:$0xff] %vm558_vm1, %v2648_v32  ;;  %2656 = vst.msk [vmem:[#allocation9] sm:$0xff] (!%p2888_p0), %vm558_vm1, %v2648_v32 }
0x10d6 PF: > { %p3199_p3 = scmp.eq.s32.totalorder %s3579_s15, 1  ;;  %s3497_s7 = smov [#allocation9]  }
0x10d7   : > { %s2667_s20 = sshll.u32 %s3497_s7, 4  ;;  %s2668_s20 = int_to_ptr.vmem [resolvable:$true] %s2667_s20 }
0x10d8   : > { %s3392_s21 = scalar_lea.vmem %s2668_s20, 256  ;;  %p3399_p2 = scmp.lt.s32.totalorder %s2668_s20, %s2668_s20 }
0x10d9   : > { %p3393_p10 = scmp.ne.s32.totalorder %s2668_s20, %s3392_s21  ;;  %p3400_p8 = scmp.lt.s32.totalorder %s3392_s21, %s3392_s21 }
0x10db   : > { %p3394_p12 = pnand %p3393_p10, %p3199_p3  ;;  %p3401_p13 = por %p3400_p8, %p3399_p2 }
0x10dd   : > { %p3395_p1 = pneg %p3394_p12 }
0x10df   : > { %p3402_p4 = pnand %p3401_p13, %p3395_p1 }
0x10e1   : > { %3405 = shalt.err (!%p3402_p4)
}
0x10e2   : > { %s4073_s18 = sld [smem:[#allocation21_spill]] }
0x10e8   : > { %s3406_s17 = scalar_lea.hbm %s4073_s18, 256 }
0x10e9   : > { %p3407_p5 = scmp.ne.s32.totalorder %s4073_s18, %s3406_s17  ;;  %p3412_p9 = scmp.lt.u32.totalorder %s3406_s17, %s4073_s18 }
0x10eb   : > { %p3408_p6 = pnand %p3407_p5, %p3199_p3 }
0x10ed   : > { %p3409_p7 = pneg %p3408_p6 }
0x10ef   : > { %p3414_p11 = pnand %p3412_p9, %p3409_p7 }
0x10f1   : > { %3417 = shalt.err (!%p3414_p11)
}
0x10f2   : > { %s3498_s0 = smov 128   ;;  %s3499_s1 = smov 8  }
0x10f3   : > { %3180 = dma.vmem_to_hbm [thread:$0]  (%p3199_p3), %s2668_s20, 256, %s4073_s18, [#allocation5], %s3498_s0, %s3498_s0, %s3499_s1  }
0x10f4   : > { %3455 = dma.done.wait (%p3199_p3), [#allocation5], 256  }
0x10f5   : > { %3457 = vsyncadd (%p3199_p3), [#allocation5], 4294967040 }
0x10f6 PF: > { %s22_s14 = sadd.s32 1, %s3480_s14   ;;  %s4074_s9 = sld [smem:[#allocation14_spill]] }
0x10f7   : > { %p19_p0 = scmp.ge.s32.totalorder %s22_s14, 4   ;;  %s4075_s30 = smov %s3464_s10 }
0x10f8   : > { %s4076_s10 = smov %s3468_s11  ;;  %s4077_s11 = smov %s3674_s8 }
0x10f9   : > { %s4078_s12 = smov %s3476_s13  ;;  %21 = sbr.rel (!%p19_p0) target bundleno = 13 (0xd), region = 129 }
0x10fc   : > { %s4079_s13 = smov %s4074_s9 }
0x1100   :  { %2683 = vsyncpa [#allocation4], 1 }
0x1101   :  { %2685 = vsyncpa [#allocation4 + $0x1], 1 }
0x1102   :  { %2686 = vsyncpa [#allocation7], 1 }
0x1103   :  { %2687 = vsyncpa [#allocation5], 1 }
0x1104   :  { %2689 = vsyncpa [#allocation5 + $0x1], 1 }

</bundles_post_ra>
